<compile_context>
chip_gen: v7x
topology: tpu7x:2x2x1
jax: 0.10.0
libtpu: 0.0.40
codegen_flags: <defaults>
</compile_context>

<pallas_src>
import itertools
import math
from functools import partial

import numpy as np
import jax
import jax.numpy as jnp
from jax.experimental import pallas as pl
from jax.experimental.pallas import tpu as pltpu


# ----------------------------------------------------------------------------
# Small helpers
# ----------------------------------------------------------------------------
def _round_up(x, m):
    return ((x + m - 1) // m) * m


def _cdiv(a, b):
    return -(-a // b)


def _pad2d(a, rows, cols, value=0):
    return jnp.pad(a, ((0, rows - a.shape[0]), (0, cols - a.shape[1])),
                   constant_values=value)


def _pad_batch(a, b_pad):
    b = a.shape[0]
    if b == b_pad:
        return a
    pad = [(0, b_pad - b)] + [(0, 0)] * (a.ndim - 1)
    return jnp.pad(a, pad)


# ----------------------------------------------------------------------------
# Kernel helpers (traced inside the Pallas kernel body) -- batched over images
# ----------------------------------------------------------------------------
def _pairwise_l1(a, bt):
    # a: (Bc, M, 4) cxcywh, bt: (Bc, 4, G) cxcywh (transposed) -> (Bc, M, G) L1
    d = jnp.abs(a[:, :, 0:1] - bt[:, 0:1, :])
    for c in range(1, 4):
        d = d + jnp.abs(a[:, :, c:c + 1] - bt[:, c:c + 1, :])
    return d


def _pairwise_giou(a, bt, eps=1e-7):
    # a: (Bc, M, 4) cxcywh, bt: (Bc, 4, G) cxcywh (transposed) -> (Bc, M, G) GIoU
    ax1 = a[:, :, 0:1] - 0.5 * a[:, :, 2:3]
    ay1 = a[:, :, 1:2] - 0.5 * a[:, :, 3:4]
    ax2 = a[:, :, 0:1] + 0.5 * a[:, :, 2:3]
    ay2 = a[:, :, 1:2] + 0.5 * a[:, :, 3:4]
    bx1 = bt[:, 0:1, :] - 0.5 * bt[:, 2:3, :]
    by1 = bt[:, 1:2, :] - 0.5 * bt[:, 3:4, :]
    bx2 = bt[:, 0:1, :] + 0.5 * bt[:, 2:3, :]
    by2 = bt[:, 1:2, :] + 0.5 * bt[:, 3:4, :]

    area_a = (ax2 - ax1) * (ay2 - ay1)          # (Bc, M, 1)
    area_b = (bx2 - bx1) * (by2 - by1)          # (Bc, 1, G)

    iw = jnp.maximum(jnp.minimum(ax2, bx2) - jnp.maximum(ax1, bx1), 0.0)
    ih = jnp.maximum(jnp.minimum(ay2, by2) - jnp.maximum(ay1, by1), 0.0)
    inter = iw * ih
    union = area_a + area_b - inter
    iou = inter / (union + eps)

    ew = jnp.maximum(ax2, bx2) - jnp.minimum(ax1, bx1)
    eh = jnp.maximum(ay2, by2) - jnp.minimum(ay1, by1)
    enclose = ew * eh
    return iou - (enclose - union) / (enclose + eps)


# ----------------------------------------------------------------------------
# Kernel 1: batched per-image matching cost matrix (HungarianMatcher cost)
# ----------------------------------------------------------------------------
def _cost_kernel(lp_ref, box_ref, gtb_ref, gtl_ref, obj_ref, gtobj_ref, c_ref,
                 *, w_obj, w_verb, w_bbox, w_giou, num_classes):
    eps = 1e-6
    lp = lp_ref[...]                                 # (Bc, 3, MP, K)
    logits = lp[:, 0]
    p0 = lp[:, 1]
    p1 = lp[:, 2]
    scores = jax.nn.sigmoid(logits) * p0 * p1        # (Bc, MP, K)

    gtl_t = gtl_ref[...]                             # (Bc, K, GP) gt labels^T
    kf = float(num_classes)
    l_sum = jnp.sum(gtl_t, axis=1, keepdims=True)    # (Bc, 1, GP)
    pos_w = gtl_t / (l_sum + eps)                    # (Bc, K, GP)
    neg_w = (1.0 - gtl_t) / (kf - l_sum + eps)       # (Bc, K, GP)
    # fused verb cost: scores@pos_w + (1-scores)@neg_w
    #                = scores@(pos_w - neg_w) + colsum(neg_w)   -- one MXU pass
    cost_verb = -0.5 * (
        jnp.einsum('bmk,bkg->bmg', scores, pos_w - neg_w,
                   preferred_element_type=jnp.float32)
        + jnp.sum(neg_w, axis=1, keepdims=True))

    boxes = box_ref[...]                             # (Bc, 2, MP, 4)
    gtb = gtb_ref[...]                               # (Bc, 2, 4, GP)
    bxh, bxo = boxes[:, 0], boxes[:, 1]
    gth, gto = gtb[:, 0], gtb[:, 1]
    cost_bbox = jnp.maximum(_pairwise_l1(bxh, gth), _pairwise_l1(bxo, gto))
    cost_giou = jnp.maximum(-_pairwise_giou(bxh, gth), -_pairwise_giou(bxo, gto))

    # cost_object = -log(same_obj * p0_max + eps); same_obj is {0,1}, so the
    # log is hoisted to the (Bc, MP, 1) column and selected with a constant.
    same_obj = obj_ref[...] == gtobj_ref[...]        # (Bc, MP, GP) bool
    p0_max = jnp.max(p0, axis=2, keepdims=True)      # (Bc, MP, 1)
    neg_log = -jnp.log(p0_max + eps)                 # MP logs, not MP*GP
    cost_object = jnp.where(same_obj, neg_log, float(-math.log(eps)))

    c_ref[...] = (cost_verb * w_verb + cost_bbox * w_bbox
                  + cost_giou * w_giou + cost_object * w_obj)


def batched_cost_matrix(lp, boxes_b, gtb, gtl, obj_b, gtobj_b, weights,
                        num_classes):
    """One gridded pallas_call over all images, Bc images per grid step.

    lp:       (B, 3, MP, K)  f32   [logits, prior_h, prior_o]
    boxes_b:  (B, 2, MP, 4)  f32   [bx_h, bx_o]
    gtb:      (B, 2, 4, GP)  f32   [gt_h^T, gt_o^T]
    gtl:      (B, K, GP)     f32   gt labels transposed
    obj_b:    (B, MP, 1)     i32
    gtobj_b:  (B, 1, GP)     i32
    returns:  (B, MP, GP)    f32 cost matrices (padded rows/cols are garbage;
                                  caller must slice [:n_i, :g_i] before use)
    """
    B, _, MP, K = lp.shape
    GP = gtl.shape[-1]

    # Batch images per step, but keep >=2 steps (when B >= 2) so the "parallel"
    # grid axis can split across v7x's two TensorCores.
    num_steps = 2 if B >= 2 else 1
    Bc = _cdiv(B, num_steps)
    B_pad = Bc * num_steps

    lp, boxes_b, gtb, gtl, obj_b, gtobj_b = (
        _pad_batch(a, B_pad) for a in (lp, boxes_b, gtb, gtl, obj_b, gtobj_b))

    w_obj, w_verb, w_bbox, w_giou = (float(w) for w in weights)
    kernel = partial(_cost_kernel, w_obj=w_obj, w_verb=w_verb,
                     w_bbox=w_bbox, w_giou=w_giou, num_classes=num_classes)
    C = pl.pallas_call(
        kernel,
        out_shape=jax.ShapeDtypeStruct((B_pad, MP, GP), jnp.float32),
        grid=(num_steps,),
        in_specs=[
            pl.BlockSpec((Bc, 3, MP, K), lambda b: (b, 0, 0, 0)),
            pl.BlockSpec((Bc, 2, MP, 4), lambda b: (b, 0, 0, 0)),
            pl.BlockSpec((Bc, 2, 4, GP), lambda b: (b, 0, 0, 0)),
            pl.BlockSpec((Bc, K, GP), lambda b: (b, 0, 0)),
            pl.BlockSpec((Bc, MP, 1), lambda b: (b, 0, 0)),
            pl.BlockSpec((Bc, 1, GP), lambda b: (b, 0, 0)),
        ],
        out_specs=pl.BlockSpec((Bc, MP, GP), lambda b: (b, 0, 0)),
        compiler_params=pltpu.CompilerParams(
            dimension_semantics=("parallel",)),
    )(lp, boxes_b, gtb, gtl, obj_b, gtobj_b)
    return C[:B]


# ----------------------------------------------------------------------------
# Kernel 2: masked binary focal loss (tiled, lane-dense, per-tile partial sums)
# ----------------------------------------------------------------------------
def _focal_kernel(lg_ref, p0_ref, p1_ref, y_ref, loss_ref, np_ref, *, alpha, gamma):
    eps = 1e-6
    lg = lg_ref[...]                                # (TILE_R, 128) f32
    pr = p0_ref[...] * p1_ref[...]                  # fused prior product (VPU)
    y = y_ref[...].astype(jnp.float32)

    sel = (pr != 0.0).astype(jnp.float32)           # torch.nonzero(prior) mask
                                                    # (also kills padded cells)

    # x = log((prior + 1e-8) / (1 + exp(-logits) - prior)), computed stably:
    num = pr + 1e-8
    den = jnp.maximum(1.0 + jnp.exp(-jnp.clip(lg, -50.0, 50.0)) - pr, 1e-12)
    r = num / den                                   # = exp(x)
    x = jnp.log(r)
    # sigmoid(x) = num / (num + den)  (algebraic -- no extra exp)
    sig_x = num / (num + den)
    # BCE-with-logits identity: max(x,0) - x*y + log1p(exp(-|x|)) == log(1+r) - x*y
    # (r <= ~1e21 given the clip/floor above, safe in f32; drops the 1/r, min, max)
    bce = jnp.log(1.0 + r) - x * y

    d = jnp.abs(y - sig_x) + eps
    if gamma == 2.0:
        pw = d * d                                   # VPU square, no EUP pow
    else:
        pw = d ** gamma
    focal = jnp.abs(1.0 - y - alpha) * pw * bce

    fm = focal * sel
    cm = sel * (y != 0.0).astype(jnp.float32)

    t = fm.shape[0]
    # per-tile partial sums, reduced to a lane-dense (8, 128) block
    loss_ref[...] = jnp.sum(fm.reshape(t // 8, 8, 128), axis=0)
    np_ref[...] = jnp.sum(cm.reshape(t // 8, 8, 128), axis=0)


def focal_loss_sum(logits, p0, p1, labels, alpha, gamma):
    """Masked binary focal loss (sum) and positive count n_p over (N, K)."""
    N, K = logits.shape
    LANES = 128
    total = N * K
    R = _cdiv(total, LANES)                          # rows of 128 lanes

    # >=2 tiles (v7x megacore); <=2048 rows/tile keeps the double-buffered input
    # footprint (~8 MiB for 4 f32-ish inputs) under v5e's 16 MiB scoped VMEM.
    MAX_TILE_R = 2048
    num_tiles = max(2, _cdiv(R, MAX_TILE_R))
    TILE_R = _round_up(_cdiv(R, num_tiles), 16)      # mult of 16: bf16-safe tile
    R_pad = TILE_R * num_tiles
    flat = R_pad * LANES

    def prep(a, dtype=jnp.float32):
        a = a.reshape(-1).astype(dtype)
        a = jnp.pad(a, (0, flat - total))            # pad = 0 -> prior==0 -> masked
        return a.reshape(R_pad, LANES)

    kernel = partial(_focal_kernel, alpha=float(alpha), gamma=float(gamma))
    in_spec = pl.BlockSpec((TILE_R, LANES), lambda i: (i, 0))
    out_spec = pl.BlockSpec((8, LANES), lambda i: (i, 0))
    part_loss, part_np = pl.pallas_call(
        kernel,
        out_shape=(jax.ShapeDtypeStruct((num_tiles * 8, LANES), jnp.float32),
                   jax.ShapeDtypeStruct((num_tiles * 8, LANES), jnp.float32)),
        grid=(num_tiles,),
        in_specs=[in_spec, in_spec, in_spec, in_spec],
        out_specs=(out_spec, out_spec),
        compiler_params=pltpu.CompilerParams(
            dimension_semantics=("parallel",)),
    )(prep(logits), prep(p0), prep(p1), prep(labels, jnp.bfloat16))
    return jnp.sum(part_loss), jnp.sum(part_np)


# ----------------------------------------------------------------------------
# Host-side glue (data-dependent: assignment, gather/scatter of tiny tensors)
# ----------------------------------------------------------------------------
# TODO(synk): Hungarian assignment (scipy.linear_sum_assignment) has no Pallas
# equivalent; solved exactly on host via brute force over permutations (G small).
def _linear_sum_assignment(C):
    C = np.asarray(C, dtype=np.float64)
    M, G = C.shape
    assert M >= G, "demo assumes #proposals >= #ground-truth pairs"
    best_rows, best_cost = None, np.inf
    cols = list(range(G))
    for rows in itertools.permutations(range(M), G):
        cost = C[list(rows), cols].sum()
        if cost < best_cost:
            best_cost, best_rows = cost, rows
    i = np.asarray(best_rows, dtype=np.int64)
    j = np.arange(G, dtype=np.int64)
    order = np.argsort(i)
    return i[order], j[order]


def _np_cxcywh_to_xyxy(b):
    cx, cy, w, h = b[:, 0], b[:, 1], b[:, 2], b[:, 3]
    return np.stack([cx - 0.5 * w, cy - 0.5 * h, cx + 0.5 * w, cy + 0.5 * h], axis=1)


def _np_paired_iou(a, b):
    x1 = np.maximum(a[:, 0], b[:, 0])
    y1 = np.maximum(a[:, 1], b[:, 1])
    x2 = np.minimum(a[:, 2], b[:, 2])
    y2 = np.minimum(a[:, 3], b[:, 3])
    inter = np.clip(x2 - x1, 0.0, None) * np.clip(y2 - y1, 0.0, None)
    area_a = (a[:, 2] - a[:, 0]) * (a[:, 3] - a[:, 1])
    area_b = (b[:, 2] - b[:, 0]) * (b[:, 3] - b[:, 1])
    return inter / (area_a + area_b - inter)


class SetCriterionPallas:
    """JAX/Pallas re-implementation of SetCriterion.forward (focal loss head)."""

    def __init__(self, args):
        self.args = args
        self._last = None

    def forward(self, boxes, bh, bo, objects, prior, logits, bbox_deltas, targets):
        B = len(boxes)
        K = self.args.num_classes
        n = [int(h.shape[0]) for h in bh]
        g = [int(t['labels'].shape[0]) for t in targets]
        offs = np.cumsum([0] + n)

        bx_h = [boxes[i][bh[i]] for i in range(B)]
        bx_o = [boxes[i][bo[i]] for i in range(B)]

        # ---- HungarianMatcher: ONE batched Pallas cost kernel + host assignment
        MP = _round_up(max(n), 8)          # proposal rows, sublane-aligned
        GP = _round_up(max(g), 128)        # gt columns, lane-dense output store

        lp = jnp.stack([jnp.stack([
            _pad2d(logits[offs[i]:offs[i + 1]], MP, K),
            _pad2d(prior[i][0], MP, K),
            _pad2d(prior[i][1], MP, K)]) for i in range(B)]).astype(jnp.float32)
        boxes_b = jnp.stack([jnp.stack([
            _pad2d(bx_h[i], MP, 4),
            _pad2d(bx_o[i], MP, 4)]) for i in range(B)]).astype(jnp.float32)
        gtb = jnp.stack([jnp.stack([
            _pad2d(targets[i]['boxes_h'].T, 4, GP),
            _pad2d(targets[i]['boxes_o'].T, 4, GP)]) for i in range(B)]
        ).astype(jnp.float32)
        gtl = jnp.stack([_pad2d(targets[i]['labels'].T, K, GP)
                         for i in range(B)]).astype(jnp.float32)
        obj_b = jnp.stack([
            jnp.pad(objects[i].astype(jnp.int32), (0, MP - n[i]),
                    constant_values=-1).reshape(MP, 1) for i in range(B)])
        gtobj_b = jnp.stack([
            jnp.pad(targets[i]['object'].astype(jnp.int32), (0, GP - g[i]),
                    constant_values=-2).reshape(1, GP) for i in range(B)])

        weights = (self.args.set_cost_object, self.args.set_cost_verb,
                   self.args.set_cost_bbox, self.args.set_cost_giou)
        C_all = np.asarray(batched_cost_matrix(
            lp, boxes_b, gtb, gtl, obj_b, gtobj_b, weights, K))  # one transfer

        # Padded rows/cols contain garbage by design -> always slice before use.
        indices = [_linear_sum_assignment(C_all[i, :n[i], :g[i]])
                   for i in range(B)]

        # ---- focal_loss: build matched labels (host), reduce in Pallas ----
        collated = []
        for i in range(B):
            idx_h, idx_o = indices[i]
            bh_np = np.asarray(bx_h[i])
            bo_np = np.asarray(bx_o[i])
            th = np.asarray(targets[i]['boxes_h'])
            to = np.asarray(targets[i]['boxes_o'])
            lab = np.asarray(targets[i]['labels'])
            iou_h = _np_paired_iou(_np_cxcywh_to_xyxy(bh_np[idx_h]),
                                   _np_cxcywh_to_xyxy(th[idx_o]))
            iou_o = _np_paired_iou(_np_cxcywh_to_xyxy(bo_np[idx_h]),
                                   _np_cxcywh_to_xyxy(to[idx_o]))
            mask = (np.minimum(iou_h, iou_o) > 0.5).astype(np.float32)[:, None]
            matched = lab[idx_o] * mask
            L = np.zeros((n[i], K), np.float32)
            L[idx_h] = matched
            collated.append(L)
        labels = jnp.asarray(np.concatenate(collated, axis=0))          # (N, K)

        prior_all = jnp.concatenate(prior, axis=1)                       # (2, N, K)
        p0_all, p1_all = prior_all[0], prior_all[1]                      # prod fused in-kernel

        # TODO(synk): torch.distributed all_reduce of n_p is skipped (single host).
        loss_sum, n_p = focal_loss_sum(logits, p0_all, p1_all, labels,
                                       self.args.alpha, self.args.gamma)
        prior_prod_np = np.asarray(p0_all) * np.asarray(p1_all)          # for ref check only
        self._last = (np.asarray(logits), prior_prod_np,
                      np.asarray(labels), np.asarray(loss_sum), np.asarray(n_p))
        return {'focal_loss': loss_sum / n_p}


def _np_focal_reference(logits, prior, labels, alpha, gamma):
    logits = np.asarray(logits, np.float64)
    prior = np.asarray(prior, np.float64)
    labels = np.asarray(labels, np.float64)
    sel = prior != 0
    x = np.log((prior[sel] + 1e-8) / (1.0 + np.exp(-logits[sel]) - prior[sel]))
    y = labels[sel]
    bce = np.maximum(x, 0.0) - x * y + np.log1p(np.exp(-np.abs(x)))
    focal = np.abs(1.0 - y - alpha) * (np.abs(y - 1.0 / (1.0 + np.exp(-x))) + 1e-6) ** gamma * bce
    return focal.sum(), float((y != 0).sum())


# ----------------------------------------------------------------------------
# Demo / self-test
# ----------------------------------------------------------------------------
if __name__ == "__main__":
    class Args:
        pass

    args = Args()
    args.num_classes = 32
    args.alpha = 0.5
    args.gamma = 2.0
    args.set_cost_object = 1.0
    args.set_cost_verb = 1.0
    args.set_cost_bbox = 2.5
    args.set_cost_giou = 1.0

    B, D, M, G, K = 2, 10, 8, 3, args.num_classes
    NUM_OBJ = 8

    key = jax.random.PRNGKey(0)
    keys = iter(jax.random.split(key, 64))

    logits = jax.random.normal(next(keys), (B * M, K), jnp.float32)

    boxes, bh, bo, objects, prior, targets = [], [], [], [], [], []
    for i in range(B):
        cxy = jax.random.uniform(next(keys), (G, 2), minval=0.3, maxval=0.7)
        wh = jax.random.uniform(next(keys), (G, 2), minval=0.1, maxval=0.3)
        gt_h = jnp.concatenate([cxy, wh], axis=1)
        cxy = jax.random.uniform(next(keys), (G, 2), minval=0.3, maxval=0.7)
        wh = jax.random.uniform(next(keys), (G, 2), minval=0.1, maxval=0.3)
        gt_o = jnp.concatenate([cxy, wh], axis=1)
        gt_labels = (jax.random.uniform(next(keys), (G, K)) < 0.2).astype(jnp.float32)
        gt_object = jax.random.randint(next(keys), (G,), 0, NUM_OBJ).astype(jnp.int32)

        cxy = jax.random.uniform(next(keys), (D, 2), minval=0.2, maxval=0.8)
        wh = jax.random.uniform(next(keys), (D, 2), minval=0.1, maxval=0.4)
        pool = jnp.concatenate([cxy, wh], axis=1)
        pool = pool.at[:G].set(gt_h).at[G:2 * G].set(gt_o)
        boxes.append(pool)

        bh_i = jnp.concatenate([jnp.arange(G),
                                jax.random.randint(next(keys), (M - G,), 0, D)]).astype(jnp.int32)
        bo_i = jnp.concatenate([jnp.arange(G, 2 * G),
                                jax.random.randint(next(keys), (M - G,), 0, D)]).astype(jnp.int32)
        bh.append(bh_i)
        bo.append(bo_i)

        obj_i = jax.random.randint(next(keys), (M,), 0, NUM_OBJ).astype(jnp.int32)
        obj_i = obj_i.at[:G].set(gt_object)
        objects.append(obj_i)

        p = jax.random.uniform(next(keys), (2, M, K), minval=0.1, maxval=1.0)
        zero_mask = jax.random.uniform(next(keys), (2, M, K)) < 0.2
        prior.append(jnp.where(zero_mask, 0.0, p))

        targets.append({'boxes_h': gt_h, 'boxes_o': gt_o,
                        'labels': gt_labels, 'object': gt_object})

    criterion = SetCriterionPallas(args)
    out = criterion.forward(boxes, bh, bo, objects, prior, logits, None, targets)
    loss = jax.block_until_ready(out['focal_loss'])

    # cross-check the focal-loss Pallas kernel against a float64 numpy reference
    lg_np, pr_np, lab_np, loss_sum_k, np_k = criterion._last
    ref_sum, ref_np = _np_focal_reference(lg_np, pr_np, lab_np, args.alpha, args.gamma)
    assert abs(float(np_k) - ref_np) < 0.5, (float(np_k), ref_np)
    np.testing.assert_allclose(float(loss_sum_k), ref_sum, rtol=1e-2)
    assert np.isfinite(float(loss))

    print("KERNEL_OK")
</pallas_src>

<mosaic_0001>
module attributes {stable_mosaic.version = 11 : i64} {
  func.func @_cost_kernel(%arg0: i32, %arg1: memref<1x3x8x32xf32, #tpu.memory_space<vmem>>, %arg2: memref<1x2x8x4xf32, #tpu.memory_space<vmem>>, %arg3: memref<1x2x4x128xf32, #tpu.memory_space<vmem>>, %arg4: memref<1x32x128xf32, #tpu.memory_space<vmem>>, %arg5: memref<1x8x1xi32, #tpu.memory_space<vmem>>, %arg6: memref<1x1x128xi32, #tpu.memory_space<vmem>>, %arg7: memref<1x8x128xf32, #tpu.memory_space<vmem>>) attributes {dimension_semantics = [#tpu.dimension_semantics<parallel>], iteration_bounds = array<i64: 2>, scalar_prefetch = 0 : i64, scratch_operands = 0 : i64, tpu.core_type = #tpu.core_type<tc>, window_params = [{transform_indices = @transform_0, window_bounds = array<i64: 1, 3, 8, 32>}, {transform_indices = @transform_1, window_bounds = array<i64: 1, 2, 8, 4>}, {transform_indices = @transform_2, window_bounds = array<i64: 1, 2, 4, 128>}, {transform_indices = @transform_3, window_bounds = array<i64: 1, 32, 128>}, {transform_indices = @transform_4, window_bounds = array<i64: 1, 8, 1>}, {transform_indices = @transform_5, window_bounds = array<i64: 1, 1, 128>}, {transform_indices = @transform_6, window_bounds = array<i64: 1, 8, 128>}]} {
    %c0 = arith.constant 0 : index
    %c0_0 = arith.constant 0 : index
    %c0_1 = arith.constant 0 : index
    %c0_2 = arith.constant 0 : index
    %0 = vector.load %arg1[%c0, %c0_0, %c0_1, %c0_2] : memref<1x3x8x32xf32, #tpu.memory_space<vmem>>, vector<1x3x8x32xf32>
    %1 = vector.extract_strided_slice %0 {offsets = [0, 0, 0, 0], sizes = [1, 1, 8, 32], strides = [1, 1, 1, 1]} : vector<1x3x8x32xf32> to vector<1x1x8x32xf32>
    %2 = vector.shape_cast %1 : vector<1x1x8x32xf32> to vector<1x8x32xf32>
    %3 = vector.extract_strided_slice %0 {offsets = [0, 1, 0, 0], sizes = [1, 1, 8, 32], strides = [1, 1, 1, 1]} : vector<1x3x8x32xf32> to vector<1x1x8x32xf32>
    %4 = vector.shape_cast %3 : vector<1x1x8x32xf32> to vector<1x8x32xf32>
    %5 = vector.extract_strided_slice %0 {offsets = [0, 2, 0, 0], sizes = [1, 1, 8, 32], strides = [1, 1, 1, 1]} : vector<1x3x8x32xf32> to vector<1x1x8x32xf32>
    %6 = vector.shape_cast %5 : vector<1x1x8x32xf32> to vector<1x8x32xf32>
    %7 = arith.negf %2 : vector<1x8x32xf32>
    %8 = math.exp %7 : vector<1x8x32xf32>
    %cst = arith.constant 1.000000e+00 : f32
    %9 = vector.broadcast %cst : f32 to vector<1x8x32xf32>
    %10 = arith.addf %9, %8 : vector<1x8x32xf32>
    %11 = arith.divf %9, %10 : vector<1x8x32xf32>
    %12 = arith.mulf %11, %4 : vector<1x8x32xf32>
    %13 = arith.mulf %12, %6 : vector<1x8x32xf32>
    %c0_3 = arith.constant 0 : index
    %c0_4 = arith.constant 0 : index
    %c0_5 = arith.constant 0 : index
    %14 = vector.load %arg4[%c0_3, %c0_4, %c0_5] : memref<1x32x128xf32, #tpu.memory_space<vmem>>, vector<1x32x128xf32>
    %cst_6 = arith.constant dense<0.000000e+00> : vector<1x128xf32>
    %15 = vector.multi_reduction <add>, %14, %cst_6 [1] : vector<1x32x128xf32> to vector<1x128xf32>
    %16 = vector.shape_cast %15 : vector<1x128xf32> to vector<1x1x128xf32>
    %cst_7 = arith.constant 9.99999997E-7 : f32
    %17 = vector.broadcast %cst_7 : f32 to vector<1x1x128xf32>
    %18 = arith.addf %16, %17 : vector<1x1x128xf32>
    %19 = vector.broadcast %18 : vector<1x1x128xf32> to vector<1x32x128xf32>
    %20 = arith.divf %14, %19 : vector<1x32x128xf32>
    %cst_8 = arith.constant 1.000000e+00 : f32
    %21 = vector.broadcast %cst_8 : f32 to vector<1x32x128xf32>
    %22 = arith.subf %21, %14 : vector<1x32x128xf32>
    %cst_9 = arith.constant 3.200000e+01 : f32
    %23 = vector.broadcast %cst_9 : f32 to vector<1x1x128xf32>
    %24 = arith.subf %23, %16 : vector<1x1x128xf32>
    %cst_10 = arith.constant 9.99999997E-7 : f32
    %25 = vector.broadcast %cst_10 : f32 to vector<1x1x128xf32>
    %26 = arith.addf %24, %25 : vector<1x1x128xf32>
    %27 = vector.broadcast %26 : vector<1x1x128xf32> to vector<1x32x128xf32>
    %28 = arith.divf %22, %27 : vector<1x32x128xf32>
    %29 = arith.subf %20, %28 : vector<1x32x128xf32>
    "tpu.trace_start"() <{level = 10 : i32, message = "bmk,bkg->bmg"}> : () -> ()
    %cst_11 = arith.constant dense<0.000000e+00> : vector<1x8x128xf32>
    %30 = tpu.matmul %13, %29, %cst_11 {dimension_numbers = #tpu.dot_dimension_numbers<[2], [1], [1], [2], [0, 0, 0, 1, 1, 2], [0], [0]>} : vector<1x8x32xf32>, vector<1x32x128xf32>, vector<1x8x128xf32> -> vector<1x8x128xf32>
    "tpu.trace_stop"() : () -> ()
    %cst_12 = arith.constant dense<0.000000e+00> : vector<1x128xf32>
    %31 = vector.multi_reduction <add>, %28, %cst_12 [1] : vector<1x32x128xf32> to vector<1x128xf32>
    %32 = vector.shape_cast %31 : vector<1x128xf32> to vector<1x1x128xf32>
    %33 = vector.broadcast %32 : vector<1x1x128xf32> to vector<1x8x128xf32>
    %34 = arith.addf %30, %33 : vector<1x8x128xf32>
    %cst_13 = arith.constant -5.000000e-01 : f32
    %35 = vector.broadcast %cst_13 : f32 to vector<1x8x128xf32>
    %36 = arith.mulf %35, %34 : vector<1x8x128xf32>
    %c0_14 = arith.constant 0 : index
    %c0_15 = arith.constant 0 : index
    %c0_16 = arith.constant 0 : index
    %c0_17 = arith.constant 0 : index
    %37 = vector.load %arg2[%c0_14, %c0_15, %c0_16, %c0_17] : memref<1x2x8x4xf32, #tpu.memory_space<vmem>>, vector<1x2x8x4xf32>
    %c0_18 = arith.constant 0 : index
    %c0_19 = arith.constant 0 : index
    %c0_20 = arith.constant 0 : index
    %c0_21 = arith.constant 0 : index
    %38 = vector.load %arg3[%c0_18, %c0_19, %c0_20, %c0_21] : memref<1x2x4x128xf32, #tpu.memory_space<vmem>>, vector<1x2x4x128xf32>
    %39 = vector.extract_strided_slice %37 {offsets = [0, 0, 0, 0], sizes = [1, 1, 8, 4], strides = [1, 1, 1, 1]} : vector<1x2x8x4xf32> to vector<1x1x8x4xf32>
    %40 = vector.shape_cast %39 : vector<1x1x8x4xf32> to vector<1x8x4xf32>
    %41 = vector.extract_strided_slice %37 {offsets = [0, 1, 0, 0], sizes = [1, 1, 8, 4], strides = [1, 1, 1, 1]} : vector<1x2x8x4xf32> to vector<1x1x8x4xf32>
    %42 = vector.shape_cast %41 : vector<1x1x8x4xf32> to vector<1x8x4xf32>
    %43 = vector.extract_strided_slice %38 {offsets = [0, 0, 0, 0], sizes = [1, 1, 4, 128], strides = [1, 1, 1, 1]} : vector<1x2x4x128xf32> to vector<1x1x4x128xf32>
    %44 = vector.shape_cast %43 : vector<1x1x4x128xf32> to vector<1x4x128xf32>
    %45 = vector.extract_strided_slice %38 {offsets = [0, 1, 0, 0], sizes = [1, 1, 4, 128], strides = [1, 1, 1, 1]} : vector<1x2x4x128xf32> to vector<1x1x4x128xf32>
    %46 = vector.shape_cast %45 : vector<1x1x4x128xf32> to vector<1x4x128xf32>
    %47 = vector.extract_strided_slice %40 {offsets = [0, 0, 0], sizes = [1, 8, 1], strides = [1, 1, 1]} : vector<1x8x4xf32> to vector<1x8x1xf32>
    %48 = vector.extract_strided_slice %44 {offsets = [0, 0, 0], sizes = [1, 1, 128], strides = [1, 1, 1]} : vector<1x4x128xf32> to vector<1x1x128xf32>
    %49 = vector.broadcast %47 : vector<1x8x1xf32> to vector<1x8x128xf32>
    %50 = vector.broadcast %48 : vector<1x1x128xf32> to vector<1x8x128xf32>
    %51 = arith.subf %49, %50 : vector<1x8x128xf32>
    %52 = math.absf %51 : vector<1x8x128xf32>
    %53 = vector.extract_strided_slice %40 {offsets = [0, 0, 1], sizes = [1, 8, 1], strides = [1, 1, 1]} : vector<1x8x4xf32> to vector<1x8x1xf32>
    %54 = vector.extract_strided_slice %44 {offsets = [0, 1, 0], sizes = [1, 1, 128], strides = [1, 1, 1]} : vector<1x4x128xf32> to vector<1x1x128xf32>
    %55 = vector.broadcast %53 : vector<1x8x1xf32> to vector<1x8x128xf32>
    %56 = vector.broadcast %54 : vector<1x1x128xf32> to vector<1x8x128xf32>
    %57 = arith.subf %55, %56 : vector<1x8x128xf32>
    %58 = math.absf %57 : vector<1x8x128xf32>
    %59 = arith.addf %52, %58 : vector<1x8x128xf32>
    %60 = vector.extract_strided_slice %40 {offsets = [0, 0, 2], sizes = [1, 8, 1], strides = [1, 1, 1]} : vector<1x8x4xf32> to vector<1x8x1xf32>
    %61 = vector.extract_strided_slice %44 {offsets = [0, 2, 0], sizes = [1, 1, 128], strides = [1, 1, 1]} : vector<1x4x128xf32> to vector<1x1x128xf32>
    %62 = vector.broadcast %60 : vector<1x8x1xf32> to vector<1x8x128xf32>
    %63 = vector.broadcast %61 : vector<1x1x128xf32> to vector<1x8x128xf32>
    %64 = arith.subf %62, %63 : vector<1x8x128xf32>
    %65 = math.absf %64 : vector<1x8x128xf32>
    %66 = arith.addf %59, %65 : vector<1x8x128xf32>
    %67 = vector.extract_strided_slice %40 {offsets = [0, 0, 3], sizes = [1, 8, 1], strides = [1, 1, 1]} : vector<1x8x4xf32> to vector<1x8x1xf32>
    %68 = vector.extract_strided_slice %44 {offsets = [0, 3, 0], sizes = [1, 1, 128], strides = [1, 1, 1]} : vector<1x4x128xf32> to vector<1x1x128xf32>
    %69 = vector.broadcast %67 : vector<1x8x1xf32> to vector<1x8x128xf32>
    %70 = vector.broadcast %68 : vector<1x1x128xf32> to vector<1x8x128xf32>
    %71 = arith.subf %69, %70 : vector<1x8x128xf32>
    %72 = math.absf %71 : vector<1x8x128xf32>
    %73 = arith.addf %66, %72 : vector<1x8x128xf32>
    %74 = vector.extract_strided_slice %42 {offsets = [0, 0, 0], sizes = [1, 8, 1], strides = [1, 1, 1]} : vector<1x8x4xf32> to vector<1x8x1xf32>
    %75 = vector.extract_strided_slice %46 {offsets = [0, 0, 0], sizes = [1, 1, 128], strides = [1, 1, 1]} : vector<1x4x128xf32> to vector<1x1x128xf32>
    %76 = vector.broadcast %74 : vector<1x8x1xf32> to vector<1x8x128xf32>
    %77 = vector.broadcast %75 : vector<1x1x128xf32> to vector<1x8x128xf32>
    %78 = arith.subf %76, %77 : vector<1x8x128xf32>
    %79 = math.absf %78 : vector<1x8x128xf32>
    %80 = vector.extract_strided_slice %42 {offsets = [0, 0, 1], sizes = [1, 8, 1], strides = [1, 1, 1]} : vector<1x8x4xf32> to vector<1x8x1xf32>
    %81 = vector.extract_strided_slice %46 {offsets = [0, 1, 0], sizes = [1, 1, 128], strides = [1, 1, 1]} : vector<1x4x128xf32> to vector<1x1x128xf32>
    %82 = vector.broadcast %80 : vector<1x8x1xf32> to vector<1x8x128xf32>
    %83 = vector.broadcast %81 : vector<1x1x128xf32> to vector<1x8x128xf32>
    %84 = arith.subf %82, %83 : vector<1x8x128xf32>
    %85 = math.absf %84 : vector<1x8x128xf32>
    %86 = arith.addf %79, %85 : vector<1x8x128xf32>
    %87 = vector.extract_strided_slice %42 {offsets = [0, 0, 2], sizes = [1, 8, 1], strides = [1, 1, 1]} : vector<1x8x4xf32> to vector<1x8x1xf32>
    %88 = vector.extract_strided_slice %46 {offsets = [0, 2, 0], sizes = [1, 1, 128], strides = [1, 1, 1]} : vector<1x4x128xf32> to vector<1x1x128xf32>
    %89 = vector.broadcast %87 : vector<1x8x1xf32> to vector<1x8x128xf32>
    %90 = vector.broadcast %88 : vector<1x1x128xf32> to vector<1x8x128xf32>
    %91 = arith.subf %89, %90 : vector<1x8x128xf32>
    %92 = math.absf %91 : vector<1x8x128xf32>
    %93 = arith.addf %86, %92 : vector<1x8x128xf32>
    %94 = vector.extract_strided_slice %42 {offsets = [0, 0, 3], sizes = [1, 8, 1], strides = [1, 1, 1]} : vector<1x8x4xf32> to vector<1x8x1xf32>
    %95 = vector.extract_strided_slice %46 {offsets = [0, 3, 0], sizes = [1, 1, 128], strides = [1, 1, 1]} : vector<1x4x128xf32> to vector<1x1x128xf32>
    %96 = vector.broadcast %94 : vector<1x8x1xf32> to vector<1x8x128xf32>
    %97 = vector.broadcast %95 : vector<1x1x128xf32> to vector<1x8x128xf32>
    %98 = arith.subf %96, %97 : vector<1x8x128xf32>
    %99 = math.absf %98 : vector<1x8x128xf32>
    %100 = arith.addf %93, %99 : vector<1x8x128xf32>
    %101 = arith.maximumf %73, %100 : vector<1x8x128xf32>
    %102 = vector.extract_strided_slice %40 {offsets = [0, 0, 0], sizes = [1, 8, 1], strides = [1, 1, 1]} : vector<1x8x4xf32> to vector<1x8x1xf32>
    %103 = vector.extract_strided_slice %40 {offsets = [0, 0, 2], sizes = [1, 8, 1], strides = [1, 1, 1]} : vector<1x8x4xf32> to vector<1x8x1xf32>
    %cst_22 = arith.constant 5.000000e-01 : f32
    %104 = vector.broadcast %cst_22 : f32 to vector<1x8x1xf32>
    %105 = arith.mulf %104, %103 : vector<1x8x1xf32>
    %106 = arith.subf %102, %105 : vector<1x8x1xf32>
    %107 = vector.extract_strided_slice %40 {offsets = [0, 0, 1], sizes = [1, 8, 1], strides = [1, 1, 1]} : vector<1x8x4xf32> to vector<1x8x1xf32>
    %108 = vector.extract_strided_slice %40 {offsets = [0, 0, 3], sizes = [1, 8, 1], strides = [1, 1, 1]} : vector<1x8x4xf32> to vector<1x8x1xf32>
    %cst_23 = arith.constant 5.000000e-01 : f32
    %109 = vector.broadcast %cst_23 : f32 to vector<1x8x1xf32>
    %110 = arith.mulf %109, %108 : vector<1x8x1xf32>
    %111 = arith.subf %107, %110 : vector<1x8x1xf32>
    %112 = vector.extract_strided_slice %40 {offsets = [0, 0, 0], sizes = [1, 8, 1], strides = [1, 1, 1]} : vector<1x8x4xf32> to vector<1x8x1xf32>
    %113 = vector.extract_strided_slice %40 {offsets = [0, 0, 2], sizes = [1, 8, 1], strides = [1, 1, 1]} : vector<1x8x4xf32> to vector<1x8x1xf32>
    %cst_24 = arith.constant 5.000000e-01 : f32
    %114 = vector.broadcast %cst_24 : f32 to vector<1x8x1xf32>
    %115 = arith.mulf %114, %113 : vector<1x8x1xf32>
    %116 = arith.addf %112, %115 : vector<1x8x1xf32>
    %117 = vector.extract_strided_slice %40 {offsets = [0, 0, 1], sizes = [1, 8, 1], strides = [1, 1, 1]} : vector<1x8x4xf32> to vector<1x8x1xf32>
    %118 = vector.extract_strided_slice %40 {offsets = [0, 0, 3], sizes = [1, 8, 1], strides = [1, 1, 1]} : vector<1x8x4xf32> to vector<1x8x1xf32>
    %cst_25 = arith.constant 5.000000e-01 : f32
    %119 = vector.broadcast %cst_25 : f32 to vector<1x8x1xf32>
    %120 = arith.mulf %119, %118 : vector<1x8x1xf32>
    %121 = arith.addf %117, %120 : vector<1x8x1xf32>
    %122 = vector.extract_strided_slice %44 {offsets = [0, 0, 0], sizes = [1, 1, 128], strides = [1, 1, 1]} : vector<1x4x128xf32> to vector<1x1x128xf32>
    %123 = vector.extract_strided_slice %44 {offsets = [0, 2, 0], sizes = [1, 1, 128], strides = [1, 1, 1]} : vector<1x4x128xf32> to vector<1x1x128xf32>
    %cst_26 = arith.constant 5.000000e-01 : f32
    %124 = vector.broadcast %cst_26 : f32 to vector<1x1x128xf32>
    %125 = arith.mulf %124, %123 : vector<1x1x128xf32>
    %126 = arith.subf %122, %125 : vector<1x1x128xf32>
    %127 = vector.extract_strided_slice %44 {offsets = [0, 1, 0], sizes = [1, 1, 128], strides = [1, 1, 1]} : vector<1x4x128xf32> to vector<1x1x128xf32>
    %128 = vector.extract_strided_slice %44 {offsets = [0, 3, 0], sizes = [1, 1, 128], strides = [1, 1, 1]} : vector<1x4x128xf32> to vector<1x1x128xf32>
    %cst_27 = arith.constant 5.000000e-01 : f32
    %129 = vector.broadcast %cst_27 : f32 to vector<1x1x128xf32>
    %130 = arith.mulf %129, %128 : vector<1x1x128xf32>
    %131 = arith.subf %127, %130 : vector<1x1x128xf32>
    %132 = vector.extract_strided_slice %44 {offsets = [0, 0, 0], sizes = [1, 1, 128], strides = [1, 1, 1]} : vector<1x4x128xf32> to vector<1x1x128xf32>
    %133 = vector.extract_strided_slice %44 {offsets = [0, 2, 0], sizes = [1, 1, 128], strides = [1, 1, 1]} : vector<1x4x128xf32> to vector<1x1x128xf32>
    %cst_28 = arith.constant 5.000000e-01 : f32
    %134 = vector.broadcast %cst_28 : f32 to vector<1x1x128xf32>
    %135 = arith.mulf %134, %133 : vector<1x1x128xf32>
    %136 = arith.addf %132, %135 : vector<1x1x128xf32>
    %137 = vector.extract_strided_slice %44 {offsets = [0, 1, 0], sizes = [1, 1, 128], strides = [1, 1, 1]} : vector<1x4x128xf32> to vector<1x1x128xf32>
    %138 = vector.extract_strided_slice %44 {offsets = [0, 3, 0], sizes = [1, 1, 128], strides = [1, 1, 1]} : vector<1x4x128xf32> to vector<1x1x128xf32>
    %cst_29 = arith.constant 5.000000e-01 : f32
    %139 = vector.broadcast %cst_29 : f32 to vector<1x1x128xf32>
    %140 = arith.mulf %139, %138 : vector<1x1x128xf32>
    %141 = arith.addf %137, %140 : vector<1x1x128xf32>
    %142 = arith.subf %116, %106 : vector<1x8x1xf32>
    %143 = arith.subf %121, %111 : vector<1x8x1xf32>
    %144 = arith.mulf %142, %143 : vector<1x8x1xf32>
    %145 = arith.subf %136, %126 : vector<1x1x128xf32>
    %146 = arith.subf %141, %131 : vector<1x1x128xf32>
    %147 = arith.mulf %145, %146 : vector<1x1x128xf32>
    %148 = vector.broadcast %116 : vector<1x8x1xf32> to vector<1x8x128xf32>
    %149 = vector.broadcast %136 : vector<1x1x128xf32> to vector<1x8x128xf32>
    %150 = arith.minimumf %148, %149 : vector<1x8x128xf32>
    %151 = vector.broadcast %106 : vector<1x8x1xf32> to vector<1x8x128xf32>
    %152 = vector.broadcast %126 : vector<1x1x128xf32> to vector<1x8x128xf32>
    %153 = arith.maximumf %151, %152 : vector<1x8x128xf32>
    %154 = arith.subf %150, %153 : vector<1x8x128xf32>
    %cst_30 = arith.constant 0.000000e+00 : f32
    %155 = vector.broadcast %cst_30 : f32 to vector<1x8x128xf32>
    %156 = arith.maximumf %154, %155 : vector<1x8x128xf32>
    %157 = vector.broadcast %121 : vector<1x8x1xf32> to vector<1x8x128xf32>
    %158 = vector.broadcast %141 : vector<1x1x128xf32> to vector<1x8x128xf32>
    %159 = arith.minimumf %157, %158 : vector<1x8x128xf32>
    %160 = vector.broadcast %111 : vector<1x8x1xf32> to vector<1x8x128xf32>
    %161 = vector.broadcast %131 : vector<1x1x128xf32> to vector<1x8x128xf32>
    %162 = arith.maximumf %160, %161 : vector<1x8x128xf32>
    %163 = arith.subf %159, %162 : vector<1x8x128xf32>
    %cst_31 = arith.constant 0.000000e+00 : f32
    %164 = vector.broadcast %cst_31 : f32 to vector<1x8x128xf32>
    %165 = arith.maximumf %163, %164 : vector<1x8x128xf32>
    %166 = arith.mulf %156, %165 : vector<1x8x128xf32>
    %167 = vector.broadcast %144 : vector<1x8x1xf32> to vector<1x8x128xf32>
    %168 = vector.broadcast %147 : vector<1x1x128xf32> to vector<1x8x128xf32>
    %169 = arith.addf %167, %168 : vector<1x8x128xf32>
    %170 = arith.subf %169, %166 : vector<1x8x128xf32>
    %cst_32 = arith.constant 1.000000e-07 : f32
    %171 = vector.broadcast %cst_32 : f32 to vector<1x8x128xf32>
    %172 = arith.addf %170, %171 : vector<1x8x128xf32>
    %173 = arith.divf %166, %172 : vector<1x8x128xf32>
    %174 = vector.broadcast %116 : vector<1x8x1xf32> to vector<1x8x128xf32>
    %175 = vector.broadcast %136 : vector<1x1x128xf32> to vector<1x8x128xf32>
    %176 = arith.maximumf %174, %175 : vector<1x8x128xf32>
    %177 = vector.broadcast %106 : vector<1x8x1xf32> to vector<1x8x128xf32>
    %178 = vector.broadcast %126 : vector<1x1x128xf32> to vector<1x8x128xf32>
    %179 = arith.minimumf %177, %178 : vector<1x8x128xf32>
    %180 = arith.subf %176, %179 : vector<1x8x128xf32>
    %181 = vector.broadcast %121 : vector<1x8x1xf32> to vector<1x8x128xf32>
    %182 = vector.broadcast %141 : vector<1x1x128xf32> to vector<1x8x128xf32>
    %183 = arith.maximumf %181, %182 : vector<1x8x128xf32>
    %184 = vector.broadcast %111 : vector<1x8x1xf32> to vector<1x8x128xf32>
    %185 = vector.broadcast %131 : vector<1x1x128xf32> to vector<1x8x128xf32>
    %186 = arith.minimumf %184, %185 : vector<1x8x128xf32>
    %187 = arith.subf %183, %186 : vector<1x8x128xf32>
    %188 = arith.mulf %180, %187 : vector<1x8x128xf32>
    %189 = arith.subf %188, %170 : vector<1x8x128xf32>
    %cst_33 = arith.constant 1.000000e-07 : f32
    %190 = vector.broadcast %cst_33 : f32 to vector<1x8x128xf32>
    %191 = arith.addf %188, %190 : vector<1x8x128xf32>
    %192 = arith.divf %189, %191 : vector<1x8x128xf32>
    %193 = arith.subf %173, %192 : vector<1x8x128xf32>
    %cst_34 = arith.constant 0.000000e+00 : f32
    %194 = vector.broadcast %cst_34 : f32 to vector<1x8x128xf32>
    %195 = arith.subf %194, %193 : vector<1x8x128xf32>
    %196 = vector.extract_strided_slice %42 {offsets = [0, 0, 0], sizes = [1, 8, 1], strides = [1, 1, 1]} : vector<1x8x4xf32> to vector<1x8x1xf32>
    %197 = vector.extract_strided_slice %42 {offsets = [0, 0, 2], sizes = [1, 8, 1], strides = [1, 1, 1]} : vector<1x8x4xf32> to vector<1x8x1xf32>
    %cst_35 = arith.constant 5.000000e-01 : f32
    %198 = vector.broadcast %cst_35 : f32 to vector<1x8x1xf32>
    %199 = arith.mulf %198, %197 : vector<1x8x1xf32>
    %200 = arith.subf %196, %199 : vector<1x8x1xf32>
    %201 = vector.extract_strided_slice %42 {offsets = [0, 0, 1], sizes = [1, 8, 1], strides = [1, 1, 1]} : vector<1x8x4xf32> to vector<1x8x1xf32>
    %202 = vector.extract_strided_slice %42 {offsets = [0, 0, 3], sizes = [1, 8, 1], strides = [1, 1, 1]} : vector<1x8x4xf32> to vector<1x8x1xf32>
    %cst_36 = arith.constant 5.000000e-01 : f32
    %203 = vector.broadcast %cst_36 : f32 to vector<1x8x1xf32>
    %204 = arith.mulf %203, %202 : vector<1x8x1xf32>
    %205 = arith.subf %201, %204 : vector<1x8x1xf32>
    %206 = vector.extract_strided_slice %42 {offsets = [0, 0, 0], sizes = [1, 8, 1], strides = [1, 1, 1]} : vector<1x8x4xf32> to vector<1x8x1xf32>
    %207 = vector.extract_strided_slice %42 {offsets = [0, 0, 2], sizes = [1, 8, 1], strides = [1, 1, 1]} : vector<1x8x4xf32> to vector<1x8x1xf32>
    %cst_37 = arith.constant 5.000000e-01 : f32
    %208 = vector.broadcast %cst_37 : f32 to vector<1x8x1xf32>
    %209 = arith.mulf %208, %207 : vector<1x8x1xf32>
    %210 = arith.addf %206, %209 : vector<1x8x1xf32>
    %211 = vector.extract_strided_slice %42 {offsets = [0, 0, 1], sizes = [1, 8, 1], strides = [1, 1, 1]} : vector<1x8x4xf32> to vector<1x8x1xf32>
    %212 = vector.extract_strided_slice %42 {offsets = [0, 0, 3], sizes = [1, 8, 1], strides = [1, 1, 1]} : vector<1x8x4xf32> to vector<1x8x1xf32>
    %cst_38 = arith.constant 5.000000e-01 : f32
    %213 = vector.broadcast %cst_38 : f32 to vector<1x8x1xf32>
    %214 = arith.mulf %213, %212 : vector<1x8x1xf32>
    %215 = arith.addf %211, %214 : vector<1x8x1xf32>
    %216 = vector.extract_strided_slice %46 {offsets = [0, 0, 0], sizes = [1, 1, 128], strides = [1, 1, 1]} : vector<1x4x128xf32> to vector<1x1x128xf32>
    %217 = vector.extract_strided_slice %46 {offsets = [0, 2, 0], sizes = [1, 1, 128], strides = [1, 1, 1]} : vector<1x4x128xf32> to vector<1x1x128xf32>
    %cst_39 = arith.constant 5.000000e-01 : f32
    %218 = vector.broadcast %cst_39 : f32 to vector<1x1x128xf32>
    %219 = arith.mulf %218, %217 : vector<1x1x128xf32>
    %220 = arith.subf %216, %219 : vector<1x1x128xf32>
    %221 = vector.extract_strided_slice %46 {offsets = [0, 1, 0], sizes = [1, 1, 128], strides = [1, 1, 1]} : vector<1x4x128xf32> to vector<1x1x128xf32>
    %222 = vector.extract_strided_slice %46 {offsets = [0, 3, 0], sizes = [1, 1, 128], strides = [1, 1, 1]} : vector<1x4x128xf32> to vector<1x1x128xf32>
    %cst_40 = arith.constant 5.000000e-01 : f32
    %223 = vector.broadcast %cst_40 : f32 to vector<1x1x128xf32>
    %224 = arith.mulf %223, %222 : vector<1x1x128xf32>
    %225 = arith.subf %221, %224 : vector<1x1x128xf32>
    %226 = vector.extract_strided_slice %46 {offsets = [0, 0, 0], sizes = [1, 1, 128], strides = [1, 1, 1]} : vector<1x4x128xf32> to vector<1x1x128xf32>
    %227 = vector.extract_strided_slice %46 {offsets = [0, 2, 0], sizes = [1, 1, 128], strides = [1, 1, 1]} : vector<1x4x128xf32> to vector<1x1x128xf32>
    %cst_41 = arith.constant 5.000000e-01 : f32
    %228 = vector.broadcast %cst_41 : f32 to vector<1x1x128xf32>
    %229 = arith.mulf %228, %227 : vector<1x1x128xf32>
    %230 = arith.addf %226, %229 : vector<1x1x128xf32>
    %231 = vector.extract_strided_slice %46 {offsets = [0, 1, 0], sizes = [1, 1, 128], strides = [1, 1, 1]} : vector<1x4x128xf32> to vector<1x1x128xf32>
    %232 = vector.extract_strided_slice %46 {offsets = [0, 3, 0], sizes = [1, 1, 128], strides = [1, 1, 1]} : vector<1x4x128xf32> to vector<1x1x128xf32>
    %cst_42 = arith.constant 5.000000e-01 : f32
    %233 = vector.broadcast %cst_42 : f32 to vector<1x1x128xf32>
    %234 = arith.mulf %233, %232 : vector<1x1x128xf32>
    %235 = arith.addf %231, %234 : vector<1x1x128xf32>
    %236 = arith.subf %210, %200 : vector<1x8x1xf32>
    %237 = arith.subf %215, %205 : vector<1x8x1xf32>
    %238 = arith.mulf %236, %237 : vector<1x8x1xf32>
    %239 = arith.subf %230, %220 : vector<1x1x128xf32>
    %240 = arith.subf %235, %225 : vector<1x1x128xf32>
    %241 = arith.mulf %239, %240 : vector<1x1x128xf32>
    %242 = vector.broadcast %210 : vector<1x8x1xf32> to vector<1x8x128xf32>
    %243 = vector.broadcast %230 : vector<1x1x128xf32> to vector<1x8x128xf32>
    %244 = arith.minimumf %242, %243 : vector<1x8x128xf32>
    %245 = vector.broadcast %200 : vector<1x8x1xf32> to vector<1x8x128xf32>
    %246 = vector.broadcast %220 : vector<1x1x128xf32> to vector<1x8x128xf32>
    %247 = arith.maximumf %245, %246 : vector<1x8x128xf32>
    %248 = arith.subf %244, %247 : vector<1x8x128xf32>
    %cst_43 = arith.constant 0.000000e+00 : f32
    %249 = vector.broadcast %cst_43 : f32 to vector<1x8x128xf32>
    %250 = arith.maximumf %248, %249 : vector<1x8x128xf32>
    %251 = vector.broadcast %215 : vector<1x8x1xf32> to vector<1x8x128xf32>
    %252 = vector.broadcast %235 : vector<1x1x128xf32> to vector<1x8x128xf32>
    %253 = arith.minimumf %251, %252 : vector<1x8x128xf32>
    %254 = vector.broadcast %205 : vector<1x8x1xf32> to vector<1x8x128xf32>
    %255 = vector.broadcast %225 : vector<1x1x128xf32> to vector<1x8x128xf32>
    %256 = arith.maximumf %254, %255 : vector<1x8x128xf32>
    %257 = arith.subf %253, %256 : vector<1x8x128xf32>
    %cst_44 = arith.constant 0.000000e+00 : f32
    %258 = vector.broadcast %cst_44 : f32 to vector<1x8x128xf32>
    %259 = arith.maximumf %257, %258 : vector<1x8x128xf32>
    %260 = arith.mulf %250, %259 : vector<1x8x128xf32>
    %261 = vector.broadcast %238 : vector<1x8x1xf32> to vector<1x8x128xf32>
    %262 = vector.broadcast %241 : vector<1x1x128xf32> to vector<1x8x128xf32>
    %263 = arith.addf %261, %262 : vector<1x8x128xf32>
    %264 = arith.subf %263, %260 : vector<1x8x128xf32>
    %cst_45 = arith.constant 1.000000e-07 : f32
    %265 = vector.broadcast %cst_45 : f32 to vector<1x8x128xf32>
    %266 = arith.addf %264, %265 : vector<1x8x128xf32>
    %267 = arith.divf %260, %266 : vector<1x8x128xf32>
    %268 = vector.broadcast %210 : vector<1x8x1xf32> to vector<1x8x128xf32>
    %269 = vector.broadcast %230 : vector<1x1x128xf32> to vector<1x8x128xf32>
    %270 = arith.maximumf %268, %269 : vector<1x8x128xf32>
    %271 = vector.broadcast %200 : vector<1x8x1xf32> to vector<1x8x128xf32>
    %272 = vector.broadcast %220 : vector<1x1x128xf32> to vector<1x8x128xf32>
    %273 = arith.minimumf %271, %272 : vector<1x8x128xf32>
    %274 = arith.subf %270, %273 : vector<1x8x128xf32>
    %275 = vector.broadcast %215 : vector<1x8x1xf32> to vector<1x8x128xf32>
    %276 = vector.broadcast %235 : vector<1x1x128xf32> to vector<1x8x128xf32>
    %277 = arith.maximumf %275, %276 : vector<1x8x128xf32>
    %278 = vector.broadcast %205 : vector<1x8x1xf32> to vector<1x8x128xf32>
    %279 = vector.broadcast %225 : vector<1x1x128xf32> to vector<1x8x128xf32>
    %280 = arith.minimumf %278, %279 : vector<1x8x128xf32>
    %281 = arith.subf %277, %280 : vector<1x8x128xf32>
    %282 = arith.mulf %274, %281 : vector<1x8x128xf32>
    %283 = arith.subf %282, %264 : vector<1x8x128xf32>
    %cst_46 = arith.constant 1.000000e-07 : f32
    %284 = vector.broadcast %cst_46 : f32 to vector<1x8x128xf32>
    %285 = arith.addf %282, %284 : vector<1x8x128xf32>
    %286 = arith.divf %283, %285 : vector<1x8x128xf32>
    %287 = arith.subf %267, %286 : vector<1x8x128xf32>
    %cst_47 = arith.constant 0.000000e+00 : f32
    %288 = vector.broadcast %cst_47 : f32 to vector<1x8x128xf32>
    %289 = arith.subf %288, %287 : vector<1x8x128xf32>
    %290 = arith.maximumf %195, %289 : vector<1x8x128xf32>
    %c0_48 = arith.constant 0 : index
    %c0_49 = arith.constant 0 : index
    %c0_50 = arith.constant 0 : index
    %291 = vector.load %arg5[%c0_48, %c0_49, %c0_50] : memref<1x8x1xi32, #tpu.memory_space<vmem>>, vector<1x8x1xi32>
    %c0_51 = arith.constant 0 : index
    %c0_52 = arith.constant 0 : index
    %c0_53 = arith.constant 0 : index
    %292 = vector.load %arg6[%c0_51, %c0_52, %c0_53] : memref<1x1x128xi32, #tpu.memory_space<vmem>>, vector<1x1x128xi32>
    %293 = vector.broadcast %291 : vector<1x8x1xi32> to vector<1x8x128xi32>
    %294 = vector.broadcast %292 : vector<1x1x128xi32> to vector<1x8x128xi32>
    %295 = arith.cmpi eq, %293, %294 : vector<1x8x128xi32>
    %cst_54 = arith.constant dense<0xFF800000> : vector<1x8xf32>
    %296 = vector.multi_reduction <maximumf>, %4, %cst_54 [2] : vector<1x8x32xf32> to vector<1x8xf32>
    %297 = vector.shape_cast %296 : vector<1x8xf32> to vector<1x8x1xf32>
    %cst_55 = arith.constant 9.99999997E-7 : f32
    %298 = vector.broadcast %cst_55 : f32 to vector<1x8x1xf32>
    %299 = arith.addf %297, %298 : vector<1x8x1xf32>
    %300 = math.log %299 : vector<1x8x1xf32>
    %cst_56 = arith.constant 0.000000e+00 : f32
    %301 = vector.broadcast %cst_56 : f32 to vector<1x8x1xf32>
    %302 = arith.subf %301, %300 : vector<1x8x1xf32>
    %cst_57 = arith.constant 13.8155107 : f32
    %303 = vector.shape_cast %302 : vector<1x8x1xf32> to vector<1x8x1xf32>
    %304 = vector.broadcast %303 : vector<1x8x1xf32> to vector<1x8x128xf32>
    %305 = vector.broadcast %cst_57 : f32 to vector<1x8x128xf32>
    %306 = arith.select %295, %304, %305 : vector<1x8x128xi1>, vector<1x8x128xf32>
    %cst_58 = arith.constant 1.000000e+00 : f32
    %307 = vector.broadcast %cst_58 : f32 to vector<1x8x128xf32>
    %308 = arith.mulf %36, %307 : vector<1x8x128xf32>
    %cst_59 = arith.constant 2.500000e+00 : f32
    %309 = vector.broadcast %cst_59 : f32 to vector<1x8x128xf32>
    %310 = arith.mulf %101, %309 : vector<1x8x128xf32>
    %311 = arith.addf %308, %310 : vector<1x8x128xf32>
    %cst_60 = arith.constant 1.000000e+00 : f32
    %312 = vector.broadcast %cst_60 : f32 to vector<1x8x128xf32>
    %313 = arith.mulf %290, %312 : vector<1x8x128xf32>
    %314 = arith.addf %311, %313 : vector<1x8x128xf32>
    %cst_61 = arith.constant 1.000000e+00 : f32
    %315 = vector.broadcast %cst_61 : f32 to vector<1x8x128xf32>
    %316 = arith.mulf %306, %315 : vector<1x8x128xf32>
    %317 = arith.addf %314, %316 : vector<1x8x128xf32>
    %c0_62 = arith.constant 0 : index
    %c0_63 = arith.constant 0 : index
    %c0_64 = arith.constant 0 : index
    %318 = vector.load %arg7[%c0_62, %c0_63, %c0_64] : memref<1x8x128xf32, #tpu.memory_space<vmem>>, vector<1x8x128xf32>
    tpu.vector_store %arg7[%c0_62, %c0_63, %c0_64], %317 {strides = array<i32>} : memref<1x8x128xf32, #tpu.memory_space<vmem>>, vector<1x8x128xf32>,
    return
  }
  func.func @transform_0(%arg0: i32) -> (i32, i32, i32, i32) {
    %c0_i32 = arith.constant 0 : i32
    %c0_i32_0 = arith.constant 0 : i32
    %c0_i32_1 = arith.constant 0 : i32
    %c0_i32_2 = arith.constant 0 : i32
    return %arg0, %c0_i32, %c0_i32_0, %c0_i32_1 : i32, i32, i32, i32
  }
  func.func @transform_1(%arg0: i32) -> (i32, i32, i32, i32) {
    %c0_i32 = arith.constant 0 : i32
    %c0_i32_0 = arith.constant 0 : i32
    %c0_i32_1 = arith.constant 0 : i32
    %c0_i32_2 = arith.constant 0 : i32
    return %arg0, %c0_i32, %c0_i32_0, %c0_i32_1 : i32, i32, i32, i32
  }
  func.func @transform_2(%arg0: i32) -> (i32, i32, i32, i32) {
    %c0_i32 = arith.constant 0 : i32
    %c0_i32_0 = arith.constant 0 : i32
    %c0_i32_1 = arith.constant 0 : i32
    %c0_i32_2 = arith.constant 0 : i32
    return %arg0, %c0_i32, %c0_i32_0, %c0_i32_1 : i32, i32, i32, i32
  }
  func.func @transform_3(%arg0: i32) -> (i32, i32, i32) {
    %c0_i32 = arith.constant 0 : i32
    %c0_i32_0 = arith.constant 0 : i32
    %c0_i32_1 = arith.constant 0 : i32
    return %arg0, %c0_i32, %c0_i32_0 : i32, i32, i32
  }
  func.func @transform_4(%arg0: i32) -> (i32, i32, i32) {
    %c0_i32 = arith.constant 0 : i32
    %c0_i32_0 = arith.constant 0 : i32
    %c0_i32_1 = arith.constant 0 : i32
    return %arg0, %c0_i32, %c0_i32_0 : i32, i32, i32
  }
  func.func @transform_5(%arg0: i32) -> (i32, i32, i32) {
    %c0_i32 = arith.constant 0 : i32
    %c0_i32_0 = arith.constant 0 : i32
    %c0_i32_1 = arith.constant 0 : i32
    return %arg0, %c0_i32, %c0_i32_0 : i32, i32, i32
  }
  func.func @transform_6(%arg0: i32) -> (i32, i32, i32) {
    %c0_i32 = arith.constant 0 : i32
    %c0_i32_0 = arith.constant 0 : i32
    %c0_i32_1 = arith.constant 0 : i32
    return %arg0, %c0_i32, %c0_i32_0 : i32, i32, i32
  }
}

</mosaic_0001>

<bundles_post_ra>
// kernel: tpu_custom_call.1
= control target key start
LH: loop header
LB: loop body
LE: loop exit
PB: predicated region body
PF: predicated region fallthrough
CT: control target
= control target key end

     0   :  { %s1629_s0 = inlined_call_operand.hbm [shape: f32[2,3,8,32], index: 0, kind: input, shape index: {}]   ;;  %s1630_s1 = inlined_call_operand.vmem [shape: f32[2,2,8,4], index: 1, kind: input, shape index: {}]   ;;  %s1631_s2 = inlined_call_operand.hbm [shape: f32[2,2,4,128], index: 2, kind: input, shape index: {}]   ;;  %s1632_s3 = inlined_call_operand.vmem [shape: f32[2,32,128], index: 3, kind: input, shape index: {}]   ;;  %s1633_s4 = inlined_call_operand.vmem [shape: s32[2,8,1], index: 4, kind: input, shape index: {}]   ;;  %s1634_s5 = inlined_call_operand.vmem [shape: s32[2,1,128], index: 5, kind: input, shape index: {}]   ;;  %s1635_s6 = inlined_call_operand.hbm [shape: f32[2,8,128], index: 6, kind: output, shape index: {}]  }
   0x1   :  { %1638 = sst [smem:[#allocation11_spill]] %s1629_s0 }
   0x2   :  { %11 = vsyncpa [#allocation3], 0 }
   0x3   :  { %13 = vsyncpa [#allocation3 + $0x1], 0 }
   0x4   :  { %14 = vsyncpa [#allocation6], 0 }
   0x5   :  { %16 = vsyncpa [#allocation6 + $0x1], 0 }
   0x6   :  { %17 = vsyncpa [#allocation4], 0 }
   0x7   :  { %19 = vsyncpa [#allocation4 + $0x1], 0  ;;  %s1293_s21 = smov 0   ;;  %s1295_s22 = smov 0  }
   0x8   :  { %s1297_s23 = smov 0   ;;  %s1299_s24 = smov 0  }
   0x9 LB: > { %s1314_s25 = sadd.s32 4294967295, %s1240_s24   ;;  %s967_s26 = sadd.s32 4294967294, %s1240_s24   ;;  %s1240_s24 = sphi %s1299_s24, %s1652_s24   ;;  %s1236_s23 = sphi %s1297_s23, %s1651_s23   ;;  %s1232_s22 = sphi %s1295_s22, %s1650_s22   ;;  %s1228_s21 = sphi %s1293_s21, %s1649_s21  }
   0xa   : > { %s1318_s27 = sadd.s32 1, %s1240_s24   ;;  %s32_s28 = sadd.s32 1, %s1236_s23 }
   0xb   : > { %s29_s29 = ssub.s32 %s1240_s24, %s1318_s27  ;;  %p39_p0 = scmp.ne.s32.totalorder %s1236_s23, %s1232_s22 }
   0xc   : > { %p30_p1 = scmp.eq.s32.totalorder %s29_s29, 0  ;;  %p40_p2 = scmp.eq.s32.totalorder %s1240_s24, 0 }
   0xd   : > { %p45_p3 = scmp.ne.s32.totalorder %s1232_s22, %s1228_s21  ;;  %p46_p4 = scmp.eq.s32.totalorder %s1314_s25, 0 }
   0xe   : > { %s1330_s30 = scalar_select %p30_p1, %s1236_s23, %s32_s28  }
   0xf   : > { %p41_p5 = por %p40_p2, %p39_p0  ;;  %p1332_p6 = por %p46_p4, %p45_p3 }
  0x10   : > { %p199_p7 = scmp.eq.s32.totalorder %s1314_s25, 1  ;;  %p205_p8 = scmp.eq.s32.totalorder %s967_s26, 1 }
  0x11   : > { %s1639_s7 = scalar_select %p1332_p6, 1, 0 }
  0x12   : > { %p1034_p10 = scmp.lt.s32.totalorder %s1240_s24, 2  ;;  %p1339_p11 = por %p199_p7, %p39_p0 }
  0x13   : > { %p1343_p12 = por %p205_p8, %p45_p3  ;;  %s1348_s10 = sand.u32 1, %s1236_s23  }
  0x14   : > { %s1640_s8 = scalar_select %p1339_p11, 1, 0 }
  0x15   : > { %s1641_s9 = scalar_select %p1343_p12, 1, 0 }
  0x16   : > { %s1015_s11 = smul.u32 384, %s1240_s24  ;;  %s1642_s0 = sld [smem:[#allocation11_spill]] }
  0x17   : > { %s1014_s12 = smul.u32 24, %s1348_s10  ;;  %p1357_p13 = pnand %p1034_p10, %p41_p5 }
  0x18   : > { %s226_s19 = scalar_lea.sflag [#allocation3], %s1348_s10 }
  0x19   : > { %s229_s17 = scalar_lea.vmem [#allocation2], %s1014_s12  ;;  %p1112_p1 = pneg %p1357_p13 }
  0x1a   : > { %s236_s18 = sshll.u32 %s229_s17, 4  ;;  %s1361_s18 = int_to_ptr.vmem [resolvable:$true] %s236_s18 }
  0x1c   : > { %s1355_s15 = scalar_lea.hbm %s1642_s0, %s1015_s11  ;;  %s1115_s29 = scalar_lea.hbm %s1642_s0, 768 }
  0x1d   : > { %s1110_s20 = scalar_lea.hbm %s1355_s15, 384  ;;  %p1116_p4 = scmp.lt.u32.totalorder %s1355_s15, %s1642_s0 }
  0x1e   : > { %p1111_p0 = scmp.ne.s32.totalorder %s1355_s15, %s1110_s20  ;;  %p1117_p5 = scmp.lt.u32.totalorder %s1115_s29, %s1110_s20 }
  0x1f   : > { %p1119_p8 = scmp.lt.u32.totalorder %s1110_s20, %s1355_s15 }
  0x20   : > { %p1113_p2 = pnand %p1112_p1, %p1111_p0  ;;  %p1118_p7 = por %p1117_p5, %p1116_p4 }
  0x22   : > { %p1114_p3 = pneg %p1113_p2  ;;  %p1120_p10 = por %p1119_p8, %p1118_p7 }
  0x24   : > { %p1121_p9 = pnand %p1120_p10, %p1114_p3 }
  0x26   : > { %1124 = shalt.err (!%p1121_p9)
}
  0x27   : > { %s1125_s12 = scalar_lea.vmem %s1361_s18, 384  ;;  %s1242_s14 = smov [#allocation2]  }
  0x28   : > { %p1126_p0 = scmp.ne.s32.totalorder %s1361_s18, %s1125_s12  ;;  %s1130_s17 = sshll.u32 %s1242_s14, 4  ;;  %s1131_s17 = int_to_ptr.vmem [resolvable:$false] %s1130_s17 }
  0x29   : > { %s1132_s26 = scalar_lea.vmem %s1131_s17, 768  ;;  %p1133_p11 = scmp.lt.s32.totalorder %s1361_s18, %s1131_s17 }
  0x2a   : > { %p1128_p2 = pnand %p1126_p0, %p1112_p1  ;;  %p1134_p4 = scmp.lt.s32.totalorder %s1132_s26, %s1125_s12 }
  0x2c   : > { %p1129_p12 = pneg %p1128_p2  ;;  %p1135_p5 = por %p1134_p4, %p1133_p11 }
  0x2e   : > { %p1136_p7 = pnand %p1135_p5, %p1129_p12 }
  0x30   : > { %1139 = shalt.err (!%p1136_p7)
}
  0x31   : > { %s1243_s20 = smov 128   ;;  %s1244_s28 = smov 8  }
  0x32   : > { %1026 = dma.hbm_to_vmem [thread:$0]  (!%p1357_p13), %s1355_s15, 384, %s1361_s18, %s226_s19, %s1243_s20, %s1243_s20, %s1244_s28  }
  0x33   : > { %p974_p9 = scmp.ge.s32.totalorder %s1240_s24, 1  ;;  %p294_p3 = scmp.lt.s32.totalorder %s1240_s24, 3 }
  0x34   : > { %s971_s29 = sshll.u32 %s1348_s10, 3  ;;  %s989_s13 = sshll.u32 %s1240_s24, 7 }
  0x35   : > { %p1394_p11 = pnand %p974_p9, %p294_p3  ;;  %s258_s12 = scalar_lea.vmem [#allocation5], %s971_s29 }
  0x36   : > { %s265_s14 = sshll.u32 %s258_s12, 4  ;;  %s1402_s0 = scalar_lea.hbm %s1631_s2, %s989_s13  ;;  %s1404_s14 = int_to_ptr.vmem [resolvable:$true] %s265_s14 }
  0x37   : > { %s255_s15 = scalar_lea.sflag [#allocation6], %s1348_s10  ;;  %s1140_s18 = scalar_lea.hbm %s1402_s0, 128 }
  0x38   : > { %p1141_p12 = scmp.ne.s32.totalorder %s1402_s0, %s1140_s18  ;;  %s1145_s28 = scalar_lea.hbm %s1631_s2, 256 }
  0x39   : > { %p1146_p0 = scmp.lt.u32.totalorder %s1402_s0, %s1631_s2  ;;  %p1147_p2 = scmp.lt.u32.totalorder %s1145_s28, %s1140_s18 }
  0x3a   : > { %p1143_p8 = pnand %p1141_p12, %p1112_p1  ;;  %p1149_p5 = scmp.lt.u32.totalorder %s1140_s18, %s1402_s0 }
  0x3b   : > { %p1148_p4 = por %p1147_p2, %p1146_p0 }
  0x3c   : > { %p1144_p10 = pneg %p1143_p8 }
  0x3d   : > { %p1150_p7 = por %p1149_p5, %p1148_p4 }
  0x3f   : > { %p1151_p9 = pnand %p1150_p7, %p1144_p10 }
  0x41   : > { %1154 = shalt.err (!%p1151_p9)
}
  0x42   : > { %s1155_s12 = scalar_lea.vmem %s1404_s14, 128  ;;  %s1245_s17 = smov [#allocation5]  }
  0x43   : > { %p1156_p3 = scmp.ne.s32.totalorder %s1404_s14, %s1155_s12  ;;  %s1160_s26 = sshll.u32 %s1245_s17, 4  ;;  %s1161_s26 = int_to_ptr.vmem [resolvable:$false] %s1160_s26 }
  0x44   : > { %s1162_s19 = scalar_lea.vmem %s1161_s26, 256  ;;  %p1163_p6 = scmp.lt.s32.totalorder %s1404_s14, %s1161_s26 }
  0x45   : > { %p1158_p12 = pnand %p1156_p3, %p1112_p1  ;;  %p1164_p0 = scmp.lt.s32.totalorder %s1162_s19, %s1155_s12 }
  0x47   : > { %p1159_p8 = pneg %p1158_p12  ;;  %p1165_p2 = por %p1164_p0, %p1163_p6 }
  0x49   : > { %p1166_p4 = pnand %p1165_p2, %p1159_p8 }
  0x4b   : > { %1169 = shalt.err (!%p1166_p4)
}
  0x4c   : > { %s1246_s18 = smov 64   ;;  %s1247_s20 = smov 4  }
  0x4d   : > { %1029 = dma.hbm_to_vmem [thread:$0]  (!%p1357_p13), %s1402_s0, 128, %s1404_s14, %s255_s15, %s1246_s18, %s1246_s18, %s1247_s20  }
  0x4e   : > { %298 = sbr.rel (%p1394_p11) target bundleno = 567 (0x237), region = 44  ;;  %s1435_s28 = sand.u32 (!%p1394_p11), 1, %s1232_s22  }
  0x4f   : > { %s1016_s29 = smul.u32 (!%p1394_p11), 24, %s1435_s28  ;;  %s301_s13 = scalar_lea.sflag (!%p1394_p11), [#allocation3], %s1435_s28 }
  0x50   : > { %p1645_p6 = scmp.ne.s32.totalorder (!%p1394_p11), %s1639_s7, 0 }
  0x51   : > { %s1439_s12 = scalar_lea.vmem (!%p1394_p11), [#allocation2], %s1016_s29 }
  0x55   : > { %1215 = dma.done.wait (%p1645_p6), %s301_s13, 384  }
  0x56   : > { %1217 = vsyncadd (%p1645_p6), %s301_s13, 4294966912  ;;  %s975_s0 = sshll.u32 %s1435_s28, 3  ;;  %s310_s10 = scalar_lea.sflag [#allocation6], %s1435_s28 }
  0x57   : > { %s1449_s16 = scalar_lea.vmem [#allocation5], %s975_s0 }
  0x58   : > { %1219 = dma.done.wait (%p1645_p6), %s310_s10, 128  }
  0x59   : > { %1221 = vsyncadd (%p1645_p6), %s310_s10, 4294967168  ;;  %p364_p13 = scmp.lt.s32.totalorder %s1314_s25, 1  ;;  %v1248_v0 = vmov 0   ;;  %s1249_s7 = smov 126   ;;  %v1250_v5 = vmov 0.0|0.0   ;;  %vm1251_vm0 = vmmov 0  }
  0x5a   : > { %1082 = vset.pattern.permute.xlu1 %v1248_v0  ;;  %1081 = vset.pattern.permute.xlu0 %v1248_v0  ;;  %v1252_v6 = vmov 0.0   ;;  %v381_v12 = vld [vmem:[%s1439_s12] sm:$0xff]  ;;  %v382_v46 = vld [vmem:[%s1439_s12 + $0x8] sm:$0xff]  ;;  %v383_v52 = vld [vmem:[%s1439_s12 + $0x10] sm:$0xff]  ;;  %vm435_vm1 = vcmask 261120   ;;  %s1253_s13 = smov 127  }
  0x5b   : > { %s1459_s11 = scalar_select %p364_p13, %s1314_s25, 1  ;;  %1008 = vmatprep.subr.bf16.mxu0 %v1250_v5  ;;  %1005 = vmatprep.mubr.msk.f32.mxu0 %vm1251_vm0, %v1252_v6  ;;  %v982_v15 = vmul.f32 -1.442695, %v381_v12  ;;  %v1254_v62 = vmov 1  }
  0x5c   : > { %p1646_p11 = scmp.ne.s32.totalorder %s1640_s8, 0 }
  0x5d   : > { %s990_s14 = sshll.u32 %s1459_s11, 4  ;;  %s991_s19 = sshll.u32 %s1459_s11, 5  ;;  %1092 = vpow2.f32 %v982_v15 }
  0x5e   : > { %s368_s26 = scalar_lea.vmem %s1630_s1, %s990_s14  ;;  %s373_s29 = scalar_lea.vmem %s1632_s3, %s991_s19 }
  0x5f   : > { %v1465_v1 = vld [vmem:[%s368_s26] sm:$0xff]  ;;  %v1467_v2 = vld [vmem:[%s368_s26 + $0x8] sm:$0xff]  ;;  %v394_v9 = vld [vmem:[%s373_s29 + $0x10] sm:$0xff]  ;;  %s981_s12 = sshll.u32 %s1459_s11, 3  ;;  %s380_s26 = scalar_lea.vmem %s1634_s5, %s1459_s11 }
  0x60   : > { %v603_v3 = vmul.f32 0.5, %v1465_v1  ;;  %v697_v4 = vmul.f32 0.5, %v1467_v2  ;;  %v392_v7 = vld [vmem:[%s373_s29] sm:$0xff]  ;;  %v393_v8 = vld [vmem:[%s373_s29 + $0x8] sm:$0xff]  ;;  %v395_v11 = vld [vmem:[%s373_s29 + $0x18] sm:$0xff]  ;;  %v413_v29 = vsub.f32 1.0, %v394_v9  ;;  %s377_s15 = scalar_lea.vmem %s1633_s4, %s981_s12 }
  0x61   : > { %v396_v10 = vadd.f32 %v393_v8, %v392_v7  ;;  %v411_v27 = vsub.f32 1.0, %v392_v7  ;;  %v412_v28 = vsub.f32 1.0, %v393_v8  ;;  %v414_v30 = vsub.f32 1.0, %v395_v11  ;;  %s363_s11 = scalar_lea.vmem [#allocation7], %s975_s0 }
  0x62   : > { %605 = vrot.lane.b32.xlu0 %v603_v3, %s1249_s7  ;;  %s829_s19 = sshll.u32 %s363_s11, 4  ;;  %s1587_s19 = int_to_ptr.vmem [resolvable:$true] %s829_s19 }
  0x63   : > { %v397_v13 = vadd.f32 %v396_v10, %v394_v9  ;;  %v792_v10 = vld [vmem:[%s377_s15] sm:$0xff]  ;;  %s1170_s12 = scalar_lea.vmem %s1587_s19, 128 }
  0x64   : > { %p1171_p1 = scmp.ne.s32.totalorder %s1587_s19, %s1170_s12 }
  0x65   : > { %v398_v14 = vadd.f32 %v397_v13, %v395_v11 }
  0x66   : > { %699 = vrot.lane.b32.xlu0 %v697_v4, %s1249_s7  ;;  %s986_s7 = sshll.u32 %s1314_s25, 7  ;;  %p1172_p10 = pnand %p1171_p1, %p1646_p11 }
  0x67   : > { %v399_v16 = vrot.slane %v398_v14, 4  ;;  %v1093_v22 = vpop.eup %1092  ;;  %s1585_s29 = scalar_lea.hbm %s1635_s6, %s986_s7  ;;  %s1257_s25 = smov [#allocation7]  }
  0x68   : > { %v387_v26 = vadd.f32 1.0, %v1093_v22  ;;  %p1173_p5 = pneg %p1172_p10  ;;  %s1174_s0 = sshll.u32 %s1257_s25, 4  ;;  %s1175_s0 = int_to_ptr.vmem [resolvable:$false] %s1174_s0 }
  0x69   : > { %v400_v17 = vadd.f32 %v399_v16, %v398_v14  ;;  %s1176_s10 = scalar_lea.vmem %s1175_s0, 256  ;;  %p1177_p7 = scmp.lt.s32.totalorder %s1587_s19, %s1175_s0 }
  0x6a   : > { %p1178_p9 = scmp.lt.s32.totalorder %s1176_s10, %s1170_s12 }
  0x6b   : > { %v401_v18 = vrot.slane %v400_v17, 2 }
  0x6c   : > { %p1179_p3 = por %p1178_p9, %p1177_p7 }
  0x6d   : > { %v402_v19 = vadd.f32 %v401_v18, %v400_v17 }
  0x6e   : > { %p1180_p12 = pnand %p1179_p3, %p1173_p5 }
  0x6f   : > { %v403_v20 = vrot.slane %v402_v19, 1 }
  0x71   : > { %v404_v21 = vadd.f32 %v403_v20, %v402_v19 }
  0x73   : > { %v405_v23 = vadd.f32 1e-06, %v404_v21  ;;  %v415_v24 = vsub.f32 32.0, %v404_v21 }
  0x75   : > { %1094 = vrcp.f32 %v405_v23  ;;  %v416_v25 = vadd.f32 1e-06, %v415_v24  ;;  %v1516_v23 = vld [vmem:[%s1449_s16 + $0x4] sm:$0xf] }
  0x76   : > { %v704_v24 = vmul.f32 0.5, %v1516_v23 }
  0x77   : > { %1096 = vrcp.f32 %v416_v25 }
  0x78   : > { %1098 = vrcp.f32 %v387_v26  ;;  %v519_v26 = vlaneseq }
  0x7f   : > { %v1095_v31 = vpop.eup %1094 }
  0x80   : > { %v407_v32 = vmul.f32 %v1095_v31, %v392_v7  ;;  %v408_v33 = vmul.f32 %v1095_v31, %v393_v8  ;;  %v409_v34 = vmul.f32 %v1095_v31, %v394_v9  ;;  %v410_v36 = vmul.f32 %v1095_v31, %v395_v11 }
  0x81   : > { %v1097_v35 = vpop.eup %1096  ;;  %v1255_v7 = vmov 2   ;;  %v1256_v8 = vmov 3   ;;  %v802_v9 = vsel %vm435_vm1, %v382_v46, -inf }
  0x82   : > { %v418_v37 = vmul.f32 %v1097_v35, %v411_v27  ;;  %v419_v38 = vmul.f32 %v1097_v35, %v412_v28  ;;  %v420_v39 = vmul.f32 %v1097_v35, %v413_v29  ;;  %v1476_v40 = vmul.f32 %v1097_v35, %v414_v30  ;;  %v1099_v41 = vpop.eup %1098 }
  0x83   : > { %v390_v50 = vmul.f32 %v1099_v41, %v382_v46  ;;  %v706_v29 = vrot.slane %v704_v24, 2  ;;  %v1527_v30 = vshrl.u32 %v519_v26, 7 }
  0x84   : > { %v422_v42 = vsub.f32 %v407_v32, %v418_v37  ;;  %v423_v43 = vsub.f32 %v408_v33, %v419_v38  ;;  %v426_v44 = vadd.f32 %v419_v38, %v418_v37  ;;  %v424_v45 = vsub.f32 %v409_v34, %v420_v39 }
  0x85   : > { %v425_v47 = vsub.f32 %v410_v36, %v1476_v40  ;;  %v391_v53 = vmul.f32 %v390_v50, %v383_v52  ;;  %v1530_v34 = vsub.s32 1, %v1527_v30  ;;  %v709_v35 = vadd.f32 %v706_v29, %v1516_v23 }
  0x86   : > { %v1009_v48 = vpack.c.bf16 %v423_v43, %v422_v42  ;;  %v427_v49 = vadd.f32 %v426_v44, %v420_v39  ;;  %v708_v36 = vsub.f32 %v1516_v23, %v706_v29  ;;  %v1535_v37 = vsub.s32 0, %v1527_v30 }
  0x87   : > { %v1012_v51 = vpack.c.bf16 %v425_v47, %v424_v45 }
  0x88   : > { %1010 = vmatpush3.bf16.msra.mxu0 %v1009_v48  ;;  %v428_v11 = vadd.f32 %v427_v49, %v1476_v40  ;;  %v750_v40 = vrot.slane %v709_v35, %v1530_v34  ;;  %v739_v43 = vrot.slane %v708_v36, %v1535_v37  ;;  %v759_v44 = vrot.slane %v708_v36, %v1530_v34 }
  0x89   : > { %1011 = vmatprep.subr.bf16.mxu0 %v1250_v5  ;;  %v716_v45 = vsub.f32 %v709_v35, %v708_v36 }
  0x8a   : > { %v429_v12 = vrot.slane %v428_v11, 4 }
  0x8c   : > { %1013 = vmatpush3.bf16.msra.mxu0 %v1012_v51  ;;  %v729_v51 = vrot.slane %v709_v35, %v1535_v37 }
  0x8f   : > { %1006 = vmatmul.mubr.msk.f32.vlgmr.msra.gmra.mrb[0].mxu0 %vm435_vm1, %v391_v53 }
  0xd4   : > { %v606_v54 = vpop.permute.xlu0 %605 }
  0xd5   : > { %v608_v55 = vsub.f32 %v1465_v1, %v606_v54  ;;  %v609_v56 = vadd.f32 %v606_v54, %v1465_v1 }
  0xd7   : > { %629 = vperm.xlu0 %1081, %v609_v56   ;;  %639 = vperm.xlu1 %1082, %v608_v55   ;;  %v616_v60 = vsub.f32 %v609_v56, %v608_v55 }
  0xd8   : > { %v700_v57 = vpop.permute.xlu0 %699 }
  0xd9   : > { %v702_v58 = vsub.f32 %v1467_v2, %v700_v57  ;;  %v703_v59 = vadd.f32 %v700_v57, %v1467_v2 }
  0xdb   : > { %618 = vrot.lane.b32.xlu1 %v616_v60, %s1253_s13  ;;  %v710_v61 = vsub.f32 %v703_v59, %v702_v58 }
  0xdc   : > { %1083 = vset.pattern.permute.xlu1 %v1254_v62 }
  0xdf   : > { %712 = vrot.lane.b32.xlu1 %v710_v61, %s1253_s13  ;;  %s816_s13 = scalar_lea.sflag [#allocation4], %s1435_s28 }
  0xe3   : > { %650 = vperm.xlu1 %1083, %v609_v56   ;;  %v718_v56 = vrot.slane %v716_v45, 1 }
  0xe7   : > { %1084 = vset.pattern.permute.xlu1 %v1248_v0 }
  0xe8   : > { %723 = vperm.xlu1 %1084, %v703_v59  }
  0xec   : > { %733 = vperm.xlu1 %1084, %v702_v58  }
  0xf0   : > { %1085 = vset.pattern.permute.xlu1 %v1254_v62 }
  0xf1   : > { %753 = vperm.xlu1 %1085, %v702_v58  }
  0xf5   : > { %1086 = vset.pattern.permute.xlu1 %v1248_v0 }
 0x156   : > { %v1488_v63 = vpop.permute.xlu1 %639  ;;  %v1507_v20 = vpop.permute.xlu0 %629 }
 0x15a   : > { %v619_v3 = vpop.permute.xlu1 %618 }
 0x15b   : > { %v621_v4 = vmul.f32 %v619_v3, %v616_v60 }
 0x15d   : > { %672 = vperm.xlu0 %1081, %v621_v4  }
 0x15e   : > { %v713_v5 = vpop.permute.xlu1 %712 }
 0x15f   : > { %v715_v6 = vmul.f32 %v713_v5, %v710_v61  ;;  %v720_v5 = vmul.f32 %v718_v56, %v716_v45 }
 0x161   : > { %516 = vperm.xlu0 %1081, %v1465_v1   ;;  %766 = vperm.xlu1 %1086, %v715_v6  }
 0x162   : > { %v505_v17 = vpop.f32.mrb[0].mxu0  ;;  %v1511_v21 = vpop.permute.xlu1 %650 }
 0x163   : > { %v1007_v18 = vpop.f32.mrb[1].mxu0 }
 0x165   : > { %560 = vperm.xlu0 %1081, %v1467_v2   ;;  %1089 = vset.pattern.permute.xlu1 %v1255_v7 }
 0x167   : > { %v1525_v28 = vpop.permute.xlu1 %723 }
 0x168   : > { %v730_v61 = vmin.f32 %v1525_v28, %v729_v51  ;;  %v778_v35 = vmax.f32 %v1525_v28, %v729_v51  ;;  %v542_v28 = vsub.s32 2, %v1527_v30  ;;  %v566_v51 = vrot.slane %v1516_v23, %v1535_v37 }
 0x169   : > { %1087 = vset.pattern.permute.xlu0 %v1254_v62 }
 0x16a   : > { %659 = vperm.xlu0 %1087, %v608_v55  }
 0x16b   : > { %v734_v33 = vpop.permute.xlu1 %733 }
 0x16c   : > { %v740_v54 = vmax.f32 %v734_v33, %v739_v43 }
 0x16e   : > { %744 = vperm.xlu0 %1087, %v703_v59   ;;  %v741_v4 = vsub.f32 %v730_v61, %v740_v54  ;;  %v587_v61 = vrot.slane %v1516_v23, %v542_v28 }
 0x170   : > { %v754_v49 = vpop.permute.xlu1 %753 }
 0x171   : > { %v760_v55 = vmax.f32 %v754_v49, %v759_v44 }
 0x172   : > { %526 = vperm.xlu0 %1087, %v1465_v1  }
 0x176   : > { %570 = vperm.xlu0 %1087, %v1467_v2  }
 0x17a   : > { %1088 = vset.pattern.permute.xlu0 %v1255_v7 }
 0x17b   : > { %537 = vperm.xlu0 %1088, %v1465_v1  }
 0x17f   : > { %1090 = vset.pattern.permute.xlu0 %v1256_v8 }
 0x180   : > { %548 = vperm.xlu0 %1090, %v1465_v1   ;;  %v430_v1 = vadd.f32 %v429_v12, %v428_v11  ;;  %v772_v11 = vrot.slane %v720_v5, %v1535_v37 }
 0x182   : > { %v431_v13 = vrot.slane %v430_v1, 2 }
 0x184   : > { %592 = vperm.xlu0 %1090, %v1467_v2   ;;  %v432_v14 = vadd.f32 %v431_v13, %v430_v1 }
 0x185   : > { %803 = vmax.xlane.f32.xlu1 %v802_v9 }
 0x186   : > { %v433_v15 = vrot.slane %v432_v14, 1 }
 0x188   : > { %1091 = vset.pattern.permute.xlu0 %v1248_v0  ;;  %v434_v16 = vadd.f32 %v433_v15, %v432_v14 }
 0x189   : > { %795 = vperm.xlu0 %1091, %v792_v10   ;;  %v742_v10 = vmax.f32 %v741_v4, 0.0 }
 0x18a   : > { %v1505_v19 = vadd.f32 %v505_v17, %v434_v16  ;;  %v779_v16 = vmin.f32 %v734_v33, %v739_v43  ;;  %v782_v17 = vmin.f32 %v754_v49, %v759_v44  ;;  %v553_v49 = vsub.s32 3, %v1527_v30 }
 0x196   : > { %581 = vperm.xlu1 %1089, %v1467_v2   ;;  %v1519_v2 = vld [vmem:[%s1449_s16] sm:$0xf] }
 0x197   : > { %v610_v27 = vmul.f32 0.5, %v1519_v2  ;;  %v554_v56 = vrot.slane %v1519_v2, %v553_v49 }
 0x199   : > { %v612_v31 = vrot.slane %v610_v27, 2 }
 0x19b   : > { %v614_v38 = vsub.f32 %v1519_v2, %v612_v31  ;;  %v615_v39 = vadd.f32 %v612_v31, %v1519_v2 }
 0x19d   : > { %v665_v41 = vrot.slane %v614_v38, %v1530_v34  ;;  %v645_v46 = vrot.slane %v614_v38, %v1535_v37  ;;  %v635_v47 = vrot.slane %v615_v39, %v1535_v37  ;;  %v656_v48 = vrot.slane %v615_v39, %v1530_v34 }
 0x19e   : > { %v622_v50 = vsub.f32 %v615_v39, %v614_v38 }
 0x19f   : > { %v646_v57 = vmax.f32 %v1488_v63, %v645_v46  ;;  %v636_v58 = vmin.f32 %v1507_v20, %v635_v47  ;;  %v657_v59 = vmin.f32 %v1511_v21, %v656_v48  ;;  %v685_v26 = vmin.f32 %v1488_v63, %v645_v46 }
 0x1a0   : > { %v624_v60 = vrot.slane %v622_v50, 1  ;;  %v684_v27 = vmax.f32 %v1507_v20, %v635_v47  ;;  %v687_v29 = vmax.f32 %v1511_v21, %v656_v48  ;;  %v576_v48 = vrot.slane %v1516_v23, %v1530_v34 }
 0x1a1   : > { %v647_v6 = vsub.f32 %v636_v58, %v646_v57 }
 0x1a2   : > { %v626_v7 = vmul.f32 %v624_v60, %v622_v50  ;;  %v686_v33 = vsub.f32 %v684_v27, %v685_v26  ;;  %v522_v50 = vrot.slane %v1519_v2, %v1535_v37  ;;  %v598_v60 = vrot.slane %v1516_v23, %v553_v49 }
 0x1a3   : > { %v648_v1 = vmax.f32 %v647_v6, 0.0 }
 0x1a4   : > { %v678_v13 = vrot.slane %v626_v7, %v1535_v37 }
 0x1dc   : > { %v1509_v0 = vpop.permute.xlu0 %672 }
 0x1dd   : > { %v679_v39 = vadd.f32 %v678_v13, %v1509_v0  ;;  %v532_v0 = vrot.slane %v1519_v2, %v1530_v34 }
 0x1e0   : > { %v1513_v22 = vpop.permute.xlu0 %516  ;;  %v767_v14 = vpop.permute.xlu1 %766 }
 0x1e1   : > { %v773_v36 = vadd.f32 %v772_v11, %v767_v14  ;;  %v523_v57 = vsub.f32 %v1513_v22, %v522_v50 }
 0x1e4   : > { %v1522_v25 = vpop.permute.xlu0 %560 }
 0x1e5   : > { %v567_v34 = vsub.f32 %v1522_v25, %v566_v51 }
 0x1e9   : > { %v660_v32 = vpop.permute.xlu0 %659 }
 0x1ea   : > { %v666_v53 = vmax.f32 %v660_v32, %v665_v41  ;;  %v688_v15 = vmin.f32 %v660_v32, %v665_v41 }
 0x1ec   : > { %v667_v3 = vsub.f32 %v657_v59, %v666_v53 }
 0x1ed   : > { %v745_v42 = vpop.permute.xlu0 %744 }
 0x1ee   : > { %v751_v52 = vmin.f32 %v745_v42, %v750_v40  ;;  %v668_v9 = vmax.f32 %v667_v3, 0.0  ;;  %v781_v12 = vmax.f32 %v745_v42, %v750_v40  ;;  %v689_v40 = vsub.f32 %v687_v29, %v688_v15 }
 0x1ef   : > { %v780_v42 = vsub.f32 %v778_v35, %v779_v16 }
 0x1f0   : > { %v761_v62 = vsub.f32 %v751_v52, %v760_v55  ;;  %v669_v31 = vmul.f32 %v668_v9, %v648_v1  ;;  %v783_v38 = vsub.f32 %v781_v12, %v782_v17  ;;  %v690_v45 = vmul.f32 %v689_v40, %v686_v33 }
 0x1f1   : > { %v527_v24 = vpop.permute.xlu0 %526  ;;  %v543_v52 = vrot.slane %v1519_v2, %v542_v28  ;;  %v524_v2 = vand.u32 2147483647, %v523_v57 }
 0x1f2   : > { %v762_v8 = vmax.f32 %v761_v62, 0.0  ;;  %v680_v41 = vsub.f32 %v679_v39, %v669_v31  ;;  %v784_v43 = vmul.f32 %v783_v38, %v780_v42  ;;  %v692_v47 = vadd.f32 1e-07, %v690_v45 }
 0x1f3   : > { %v533_v53 = vsub.f32 %v527_v24, %v532_v0 }
 0x1f4   : > { %v763_v18 = vmul.f32 %v762_v8, %v742_v10  ;;  %v681_v46 = vadd.f32 1e-07, %v680_v41  ;;  %v786_v20 = vadd.f32 1e-07, %v784_v43  ;;  %v568_v8 = vand.u32 2147483647, %v567_v34 }
 0x1f5   : > { %v571_v44 = vpop.permute.xlu0 %570  ;;  %v534_v37 = vand.u32 2147483647, %v533_v53  ;;  %v691_v13 = vsub.f32 %v690_v45, %v680_v41  ;;  %v984_v41 = vld [vmem:[%s380_s26] ss:$0 sm:$0xff] }
 0x1f6   : > { %v774_v32 = vsub.f32 %v773_v36, %v763_v18  ;;  %v577_v54 = vsub.f32 %v571_v44, %v576_v48 }
 0x1f7   : > { %v535_v23 = vadd.f32 %v534_v37, %v524_v2 }
 0x1f8   : > { %v775_v63 = vadd.f32 1e-07, %v774_v32  ;;  %v578_v3 = vand.u32 2147483647, %v577_v54  ;;  %v785_v22 = vsub.f32 %v784_v43, %v774_v32 }
 0x1fa   : > { %1100 = vrcp.f32 %v775_v63  ;;  %v538_v21 = vpop.permute.xlu0 %537  ;;  %v579_v14 = vadd.f32 %v578_v3, %v568_v8 }
 0x1fb   : > { %1102 = vrcp.f32 %v681_v46  ;;  %v544_v59 = vsub.f32 %v538_v21, %v543_v52 }
 0x1fc   : > { %1104 = vrcp.f32 %v786_v20 }
 0x1fd   : > { %1106 = vrcp.f32 %v692_v47  ;;  %v545_v11 = vand.u32 2147483647, %v544_v59 }
 0x1ff   : > { %v549_v55 = vpop.permute.xlu0 %548  ;;  %v546_v27 = vadd.f32 %v545_v11, %v535_v23 }
 0x200   : > { %v555_v6 = vsub.f32 %v549_v55, %v554_v56 }
 0x202   : > { %v556_v17 = vand.u32 2147483647, %v555_v6 }
 0x203   : > { %v593_v4 = vpop.permute.xlu0 %592 }
 0x204   : > { %v1101_v62 = vpop.eup %1100  ;;  %v599_v12 = vsub.f32 %v593_v4, %v598_v60  ;;  %v557_v38 = vadd.f32 %v556_v17, %v546_v27 }
 0x205   : > { %v1103_v5 = vpop.eup %1102  ;;  %v777_v10 = vmul.f32 %v1101_v62, %v763_v18 }
 0x206   : > { %v1105_v7 = vpop.eup %1104  ;;  %v683_v15 = vmul.f32 %v1103_v5, %v669_v31  ;;  %v600_v29 = vand.u32 2147483647, %v599_v12  ;;  %v509_v31 = vmul.f32 -0.5, %v1505_v19 }
 0x207   : > { %v1107_v25 = vpop.eup %1106  ;;  %v788_v16 = vmul.f32 %v1105_v7, %v785_v22 }
 0x208   : > { %v694_v26 = vmul.f32 %v1107_v25, %v691_v13  ;;  %v796_v43 = vpop.permute.xlu0 %795 }
 0x209   : > { %v789_v36 = vsub.f32 %v777_v10, %v788_v16  ;;  %vm801_vm2 = vcmp.eq.s32.totalorder %v796_v43, %v984_v41 }
 0x20a   : > { %v695_v18 = vsub.f32 %v683_v15, %v694_v26 }
 0x20b   : > { %v790_v32 = vsub.f32 0.0, %v789_v36 }
 0x20c   : > { %v696_v45 = vsub.f32 0.0, %v695_v18 }
 0x20e   : > { %v791_v20 = vmax.f32 %v696_v45, %v790_v32 }
 0x212   : > { %v804_v58 = vpop.xlane.xlu1 %803 }
 0x213   : > { %v805_v30 = vadd.f32 1e-06, %v804_v58 }
 0x215   : > { %1108 = vlog2.f32 %v805_v30 }
 0x216   : > { %v582_v9 = vpop.permute.xlu1 %581 }
 0x217   : > { %v588_v1 = vsub.f32 %v582_v9, %v587_v61 }
 0x219   : > { %v589_v24 = vand.u32 2147483647, %v588_v1 }
 0x21b   : > { %v590_v35 = vadd.f32 %v589_v24, %v579_v14 }
 0x21d   : > { %v601_v39 = vadd.f32 %v600_v29, %v590_v35 }
 0x21f   : > { %v1109_v40 = vpop.eup %1108  ;;  %v602_v42 = vmax.f32 %v557_v38, %v601_v39 }
 0x220   : > { %v807_v33 = vmul.f32 0.6931472, %v1109_v40 }
 0x221   : > { %v810_v44 = vmul.f32 2.5, %v602_v42 }
 0x222   : > { %v808_v63 = vsub.f32 0.0, %v807_v33 }
 0x223   : > { %v811_v46 = vadd.f32 %v810_v44, %v509_v31 }
 0x224   : > { %v809_v21 = vsel %vm801_vm2, %v808_v63, 13.815511 }
 0x225   : > { %v812_v47 = vadd.f32 %v811_v46, %v791_v20 }
 0x227   : > { %v813_v19 = vadd.f32 %v812_v47, %v809_v21 }
 0x229   : > { %814 = vst [vmem:[%s363_s11] sm:$0xff] %v813_v19 }
 0x22a   : > { %1183 = shalt.err (!%p1180_p12)
}
 0x22b   : > { %s1184_s28 = scalar_lea.hbm %s1585_s29, 128  ;;  %s1188_s16 = scalar_lea.hbm %s1635_s6, 256 }
 0x22c   : > { %p1185_p8 = scmp.ne.s32.totalorder %s1585_s29, %s1184_s28  ;;  %p1189_p4 = scmp.lt.u32.totalorder %s1585_s29, %s1635_s6 }
 0x22d   : > { %p1190_p6 = scmp.lt.u32.totalorder %s1188_s16, %s1184_s28  ;;  %p1192_p1 = scmp.lt.u32.totalorder %s1184_s28, %s1585_s29 }
 0x22e   : > { %p1186_p0 = pnand %p1185_p8, %p1646_p11 }
 0x22f   : > { %p1191_p13 = por %p1190_p6, %p1189_p4 }
 0x230   : > { %p1187_p2 = pneg %p1186_p0 }
 0x231   : > { %p1193_p10 = por %p1192_p1, %p1191_p13 }
 0x233   : > { %p1194_p5 = pnand %p1193_p10, %p1187_p2 }
 0x235   : > { %1197 = shalt.err (!%p1194_p5)
}
 0x236   : > { %1021 = dma.vmem_to_hbm [thread:$0]  (%p1646_p11), %s1587_s19, 128, %s1585_s29, %s816_s13  }
 0x237 PF: > { %s841_s7 = sand.u32 1, %s1228_s21   ;;  %p1647_p7 = scmp.ne.s32.totalorder %s1641_s9, 0 }
 0x238   : > { %p1648_p9 = scmp.ge.s32.totalorder %s1240_s24, 2  ;;  %s842_s11 = scalar_lea.sflag [#allocation4], %s841_s7 }
 0x23a   : > { %p1031_p3 = pnand %p1648_p9, %p1647_p7 }
 0x23c   : > { %1223 = dma.done.wait (!%p1031_p3), %s842_s11, 128  }
 0x23d   : > { %1225 = vsyncadd (!%p1031_p3), %s842_s11, 4294967168  ;;  %p22_p12 = scmp.ge.s32.totalorder %s1318_s27, 4   ;;  %s1649_s21 = smov %s1232_s22 }
 0x23e   : > { %s1650_s22 = smov %s1236_s23  ;;  %s1651_s23 = smov %s1330_s30 }
 0x23f   : > { %s1652_s24 = smov %s1318_s27  ;;  %24 = sbr.rel (!%p22_p12) target bundleno = 9 (0x9), region = 114 }
 0x246   :  { %847 = vsyncpa [#allocation3], 1 }
 0x247   :  { %849 = vsyncpa [#allocation3 + $0x1], 1 }
 0x248   :  { %850 = vsyncpa [#allocation6], 1 }
 0x249   :  { %852 = vsyncpa [#allocation6 + $0x1], 1 }
 0x24a   :  { %853 = vsyncpa [#allocation4], 1 }
 0x24b   :  { %855 = vsyncpa [#allocation4 + $0x1], 1 }

</bundles_post_ra>
